<compile_context>
chip_gen: v7x
topology: tpu7x:2x2x1
jax: 0.10.0
libtpu: 0.0.40
codegen_flags: <defaults>
</compile_context>

<pallas_src>
import functools
import math

import jax
import jax.numpy as jnp
from jax.experimental import pallas as pl
from jax.experimental.pallas import tpu as pltpu

# ----------------------------- config ---------------------------------------
VOCAB = 64
HIDDEN = 32
N_HEADS = 2
HEAD_DIM = HIDDEN // N_HEADS
N_LAYERS = 2
FFN = 64
SEQ = 8
NUM_CLASS = 2
PAD_ID = 1                 # RoBERTa convention: mask = (ids != 1)

LANES = 128                # lane-dense slab width
ROW_ALIGN = 16             # bf16 sublane-tile height -> keep slab blocks aligned

_VMEM = pl.BlockSpec(memory_space=pltpu.MemorySpace.VMEM)

assert SEQ & (SEQ - 1) == 0, "SEQ must be a power of two (batch-index via shift)"


# ----------------------------- parameter slab layout --------------------------
def _build_layouts():
    w_layout, r = {}, 0

    def addw(name, rows, cols):
        nonlocal r
        w_layout[name] = (r, rows, cols)
        r += ((rows + ROW_ALIGN - 1) // ROW_ALIGN) * ROW_ALIGN

    addw("tok_emb", VOCAB, HIDDEN)
    addw("pos_emb", SEQ, HIDDEN)
    for li in range(N_LAYERS):
        addw(f"wqkv{li}", HIDDEN, 3 * HIDDEN)     # Wq|Wk|Wv fused
        addw(f"wo{li}", HIDDEN, HIDDEN)
        addw(f"w1{li}", HIDDEN, FFN)
        addw(f"w2{li}", FFN, HIDDEN)
    addw("head_wd", HIDDEN, HIDDEN)
    addw("head_wo", HIDDEN, NUM_CLASS)
    w_rows = r

    v_layout, rv = {}, 0

    def addv(name, cols):
        nonlocal rv
        v_layout[name] = (rv, cols)
        rv += 1

    addv("emb_ln_g", HIDDEN)
    addv("emb_ln_b", HIDDEN)
    for li in range(N_LAYERS):
        for nm, c in (("bqkv", 3 * HIDDEN), ("bo", HIDDEN),
                      ("ln1_g", HIDDEN), ("ln1_b", HIDDEN),
                      ("b1", FFN), ("b2", HIDDEN),
                      ("ln2_g", HIDDEN), ("ln2_b", HIDDEN)):
            addv(f"{nm}{li}", c)
    addv("head_bd", HIDDEN)
    addv("head_bo", NUM_CLASS)
    v_rows = ((rv + 7) // 8) * 8
    return w_layout, w_rows, v_layout, v_rows


W_LAYOUT, W_ROWS, V_LAYOUT, V_ROWS = _build_layouts()


# ----------------------------- fused kernel ----------------------------------
def _bt_fused_kernel(*refs, batch, with_loss, out_rows):
    if with_loss:
        ids_col_ref, ids_row_ref, labels_ref, w_ref, v_ref, out_ref = refs
    else:
        ids_col_ref, ids_row_ref, w_ref, v_ref, out_ref = refs
        labels_ref = None

    B = batch
    S = SEQ
    BS = B * S
    H = HIDDEN
    NH = N_HEADS
    Dh = HEAD_DIM
    C = NUM_CLASS
    scale = 1.0 / math.sqrt(Dh)
    f32 = jnp.float32
    bf16 = jnp.bfloat16

    def wslab(name):
        r0, nr, nc = W_LAYOUT[name]
        return w_ref[r0:r0 + nr, 0:nc]                      # bf16 [nr, nc]

    def vrow(name):
        r0, nc = V_LAYOUT[name]
        return v_ref[r0:r0 + 1, 0:nc]                       # f32  [1, nc]

    def ln(x, gname, bname):
        mu = jnp.mean(x, axis=-1, keepdims=True)
        var = jnp.mean((x - mu) * (x - mu), axis=-1, keepdims=True)
        return (x - mu) * jax.lax.rsqrt(var + 1e-5) * vrow(gname) + vrow(bname)

    def gelu(x):
        # tanh-approx GELU (EUP tanh); HF RoBERTa default 'gelu' is erf-based,
        # so there is a tiny numeric deviation from the reference encoder.
        return 0.5 * x * (1.0 + jnp.tanh(0.7978845608028654 *
                                         (x + 0.044715 * x * x * x)))

    # ---- embedding: in-kernel one-hot (iota == ids) @ tok_emb on the MXU ------
    ids_col = ids_col_ref[...]                                          # [BS,1] i32
    onehot = (jax.lax.broadcasted_iota(jnp.int32, (BS, VOCAB), 1)
              == ids_col).astype(bf16)                                  # [BS,VOCAB]
    h = jnp.dot(onehot, wslab("tok_emb"), preferred_element_type=f32)   # [BS,H]
    pos = wslab("pos_emb").astype(f32)                                  # [S,H]
    h = (h.reshape(B, S, H) + pos[None, :, :]).reshape(BS, H)
    h = ln(h, "emb_ln_g", "emb_ln_b")

    # ---- additive attention mask, built ONCE before the layer loop -----------
    # block-diagonal (no cross-batch attention) AND key-not-pad
    ids_row = ids_row_ref[...]                                          # [1,BS] i32
    key_ok = ids_row != PAD_ID
    shift = int(math.log2(S))
    ri = jax.lax.broadcasted_iota(jnp.int32, (BS, BS), 0)
    ci = jax.lax.broadcasted_iota(jnp.int32, (BS, BS), 1)
    same_batch = jnp.right_shift(ri, shift) == jnp.right_shift(ci, shift)
    mask_bias = jnp.where(jnp.logical_and(same_batch, key_ok),
                          0.0, -1e9).astype(f32)                        # [BS,BS]

    # ---- transformer layers (unrolled, fully VMEM/vreg resident) --------------
    for li in range(N_LAYERS):
        qkv = (jnp.dot(h.astype(bf16), wslab(f"wqkv{li}"),
                       preferred_element_type=f32) + vrow(f"bqkv{li}"))  # [BS,3H]
        heads = []
        for hi in range(NH):
            q = qkv[:, hi * Dh:(hi + 1) * Dh].astype(bf16)
            k = qkv[:, H + hi * Dh:H + (hi + 1) * Dh].astype(bf16)
            v = qkv[:, 2 * H + hi * Dh:2 * H + (hi + 1) * Dh].astype(bf16)
            # all batches in one matmul; cross-batch terms killed by mask_bias
            s = jax.lax.dot_general(q, k, (((1,), (1,)), ((), ())),
                                    preferred_element_type=f32) * scale
            s = s + mask_bias
            s = s - jnp.max(s, axis=-1, keepdims=True)
            p = jnp.exp(s)
            p = p * pl.reciprocal(jnp.sum(p, axis=-1, keepdims=True), approx=True)
            heads.append(jnp.dot(p.astype(bf16), v, preferred_element_type=f32))
        attn = jnp.concatenate(heads, axis=-1)                           # [BS,H]
        attn = (jnp.dot(attn.astype(bf16), wslab(f"wo{li}"),
                        preferred_element_type=f32) + vrow(f"bo{li}"))
        h = ln(h + attn, f"ln1_g{li}", f"ln1_b{li}")

        t = (jnp.dot(h.astype(bf16), wslab(f"w1{li}"),
                     preferred_element_type=f32) + vrow(f"b1{li}"))
        t = gelu(t)
        ffn = (jnp.dot(t.astype(bf16), wslab(f"w2{li}"),
                       preferred_element_type=f32) + vrow(f"b2{li}"))
        h = ln(h + ffn, f"ln2_g{li}", f"ln2_b{li}")

    # ---- classification head on the [CLS] rows --------------------------------
    cls = h.reshape(B, S, H)[:, 0:1, :].reshape(B, H)
    hd = jnp.tanh(jnp.dot(cls.astype(bf16), wslab("head_wd"),
                          preferred_element_type=f32) + vrow("head_bd"))
    logits = (jnp.dot(hd.astype(bf16), wslab("head_wo"),
                      preferred_element_type=f32) + vrow("head_bo"))     # [B,C]

    m = jnp.max(logits, axis=-1, keepdims=True)
    e = jnp.exp(logits - m)
    z = jnp.sum(e, axis=-1, keepdims=True)
    prob = e * pl.reciprocal(z, approx=True)                             # [B,C]

    if with_loss:
        labels_col = labels_ref[...]                                     # [B,1] i32
        y = (jax.lax.broadcasted_iota(jnp.int32, (B, C), 1)
             == labels_col).astype(f32)
        logp = (logits - m) - jnp.log(z)
        nll = -jnp.sum(y * logp, axis=-1, keepdims=True)                 # [B,1]
        loss = jnp.sum(nll, axis=0, keepdims=True) * (1.0 / B)           # [1,1]
        combined = jnp.concatenate([prob, jnp.broadcast_to(loss, (B, 1))], axis=1)
    else:
        combined = prob

    # single lane-dense output slab -> one unmasked store, one writeback DMA
    cw = combined.shape[1]
    out = jnp.concatenate([combined, jnp.zeros((B, LANES - cw), f32)], axis=1)
    out = jnp.concatenate([out, jnp.zeros((out_rows - B, LANES), f32)], axis=0)
    out_ref[...] = out


# ----------------------------- parameters (pre-packed slabs) ------------------
def init_params(key):
    ks = iter(jax.random.split(key, 4 + N_LAYERS * 4 + 4))

    def nrm(shape):
        return 0.02 * jax.random.normal(next(ks), shape, dtype=jnp.float32)

    def putw(slab, name, mat):
        r0, nr, nc = W_LAYOUT[name]
        return slab.at[r0:r0 + nr, 0:nc].set(mat)

    w_slab = jnp.zeros((W_ROWS, LANES), jnp.float32)
    w_slab = putw(w_slab, "tok_emb", nrm((VOCAB, HIDDEN)))
    w_slab = putw(w_slab, "pos_emb", nrm((SEQ, HIDDEN)))
    for li in range(N_LAYERS):
        w_slab = putw(w_slab, f"wqkv{li}", nrm((HIDDEN, 3 * HIDDEN)))
        w_slab = putw(w_slab, f"wo{li}", nrm((HIDDEN, HIDDEN)))
        w_slab = putw(w_slab, f"w1{li}", nrm((HIDDEN, FFN)))
        w_slab = putw(w_slab, f"w2{li}", nrm((FFN, HIDDEN)))
    w_slab = putw(w_slab, "head_wd", nrm((HIDDEN, HIDDEN)))
    w_slab = putw(w_slab, "head_wo", nrm((HIDDEN, NUM_CLASS)))

    v_slab = jnp.zeros((V_ROWS, LANES), jnp.float32)
    for name, (r0, nc) in V_LAYOUT.items():
        if "_g" in name:                        # LayerNorm gammas start at 1
            v_slab = v_slab.at[r0, 0:nc].set(jnp.ones((nc,), jnp.float32))
        # biases / betas stay 0

    return {"w_slab": w_slab.astype(jnp.bfloat16), "v_slab": v_slab}


# ----------------------------- forward ----------------------------------------
def bt_model_forward(params, text_input_ids, labels=None):
    """Mirrors BTModel.forward: (loss, prob) if labels is given, else prob."""
    B, S = text_input_ids.shape
    assert S == SEQ
    BS = B * S
    out_rows = max(8, ((B + 7) // 8) * 8)

    ids = text_input_ids.astype(jnp.int32)
    ids_col = ids.reshape(BS, 1)      # for one-hot / embedding
    ids_row = ids.reshape(1, BS)      # for key-pad mask

    with_loss = labels is not None
    inputs = [ids_col, ids_row]
    if with_loss:
        inputs.append(labels.astype(jnp.int32).reshape(B, 1))
    inputs += [params["w_slab"], params["v_slab"]]

    kernel = functools.partial(_bt_fused_kernel, batch=B,
                               with_loss=with_loss, out_rows=out_rows)
    out = pl.pallas_call(
        kernel,
        out_shape=jax.ShapeDtypeStruct((out_rows, LANES), jnp.float32),
        in_specs=[_VMEM] * len(inputs),
        out_specs=_VMEM,
    )(*inputs)

    prob = out[:B, :NUM_CLASS]
    if with_loss:
        return out[0, NUM_CLASS], prob
    return prob


# ----------------------------- main -------------------------------------------
if __name__ == "__main__":
    key = jax.random.PRNGKey(0)
    kp, kid, klab = jax.random.split(key, 3)

    params = init_params(kp)

    B, S = 2, SEQ
    input_ids = jax.random.randint(kid, (B, S), 0, VOCAB, dtype=jnp.int32)
    input_ids = input_ids.at[:, 0].set(0)          # <s> token
    input_ids = input_ids.at[:, -2:].set(PAD_ID)   # padding -> exercises the mask
    labels = jax.random.randint(klab, (B,), 0, NUM_CLASS, dtype=jnp.int32)

    loss, prob = bt_model_forward(params, input_ids, labels)
    jax.block_until_ready((loss, prob))

    prob_only = bt_model_forward(params, input_ids, None)
    jax.block_until_ready(prob_only)

    assert prob.shape == (B, NUM_CLASS)
    assert prob_only.shape == (B, NUM_CLASS)
    assert loss.shape == ()
    assert bool(jnp.all(jnp.isfinite(prob)))
    assert bool(jnp.isfinite(loss))
    assert bool(jnp.all(jnp.abs(jnp.sum(prob, axis=-1) - 1.0) < 1e-2))

    print("KERNEL_OK")
</pallas_src>

<mosaic_0001>
module attributes {stable_mosaic.version = 11 : i64} {
  func.func @_bt_fused_kernel(%arg0: memref<16x1xi32, #tpu.memory_space<vmem>>, %arg1: memref<1x16xi32, #tpu.memory_space<vmem>>, %arg2: memref<2x1xi32, #tpu.memory_space<vmem>>, %arg3: memref<464x128xbf16, #tpu.memory_space<vmem>>, %arg4: memref<24x128xf32, #tpu.memory_space<vmem>>, %arg5: memref<8x128xf32, #tpu.memory_space<vmem>>) attributes {dimension_semantics = [], scalar_prefetch = 0 : i64, scratch_operands = 0 : i64, tpu.core_type = #tpu.core_type<tc>} {
    %c0 = arith.constant 0 : index
    %c0_0 = arith.constant 0 : index
    %0 = vector.load %arg0[%c0, %c0_0] : memref<16x1xi32, #tpu.memory_space<vmem>>, vector<16x1xi32>
    %1 = tpu.iota {dimensions = array<i32: 1>} : vector<16x64xi32>
    %2 = vector.broadcast %0 : vector<16x1xi32> to vector<16x64xi32>
    %3 = arith.cmpi eq, %1, %2 : vector<16x64xi32>
    %4 = arith.extui %3 : vector<16x64xi1> to vector<16x64xi32>
    %5 = arith.sitofp %4 : vector<16x64xi32> to vector<16x64xf32>
    %6 = arith.truncf %5 : vector<16x64xf32> to vector<16x64xbf16>
    %c0_1 = arith.constant 0 : index
    %c0_2 = arith.constant 0 : index
    %7 = vector.load %arg3[%c0_1, %c0_2] : memref<464x128xbf16, #tpu.memory_space<vmem>>, vector<64x32xbf16>
    %cst = arith.constant dense<0.000000e+00> : vector<16x32xf32>
    %8 = tpu.matmul %6, %7, %cst {dimension_numbers = #tpu.dot_dimension_numbers<[1], [0], [0], [1], [0, 0, 1, 1], [], []>} : vector<16x64xbf16>, vector<64x32xbf16>, vector<16x32xf32> -> vector<16x32xf32>
    %c64 = arith.constant 64 : index
    %c0_3 = arith.constant 0 : index
    %9 = vector.load %arg3[%c64, %c0_3] : memref<464x128xbf16, #tpu.memory_space<vmem>>, vector<8x32xbf16>
    %10 = arith.extf %9 : vector<8x32xbf16> to vector<8x32xf32>
    %11 = vector.shape_cast %8 : vector<16x32xf32> to vector<2x8x32xf32>
    %12 = vector.shape_cast %10 : vector<8x32xf32> to vector<1x8x32xf32>
    %13 = vector.broadcast %12 : vector<1x8x32xf32> to vector<2x8x32xf32>
    %14 = arith.addf %11, %13 : vector<2x8x32xf32>
    %15 = vector.shape_cast %14 : vector<2x8x32xf32> to vector<16x32xf32>
    %cst_4 = arith.constant dense<0.000000e+00> : vector<16xf32>
    %16 = vector.multi_reduction <add>, %15, %cst_4 [1] : vector<16x32xf32> to vector<16xf32>
    %17 = vector.shape_cast %16 : vector<16xf32> to vector<16x1xf32>
    %cst_5 = arith.constant 3.200000e+01 : f32
    %18 = vector.broadcast %cst_5 : f32 to vector<16x1xf32>
    %19 = arith.divf %17, %18 : vector<16x1xf32>
    %20 = vector.broadcast %19 : vector<16x1xf32> to vector<16x32xf32>
    %21 = arith.subf %15, %20 : vector<16x32xf32>
    %22 = vector.broadcast %19 : vector<16x1xf32> to vector<16x32xf32>
    %23 = arith.subf %15, %22 : vector<16x32xf32>
    %24 = arith.mulf %21, %23 : vector<16x32xf32>
    %cst_6 = arith.constant dense<0.000000e+00> : vector<16xf32>
    %25 = vector.multi_reduction <add>, %24, %cst_6 [1] : vector<16x32xf32> to vector<16xf32>
    %26 = vector.shape_cast %25 : vector<16xf32> to vector<16x1xf32>
    %cst_7 = arith.constant 3.200000e+01 : f32
    %27 = vector.broadcast %cst_7 : f32 to vector<16x1xf32>
    %28 = arith.divf %26, %27 : vector<16x1xf32>
    %29 = vector.broadcast %19 : vector<16x1xf32> to vector<16x32xf32>
    %30 = arith.subf %15, %29 : vector<16x32xf32>
    %cst_8 = arith.constant 9.99999974E-6 : f32
    %31 = vector.broadcast %cst_8 : f32 to vector<16x1xf32>
    %32 = arith.addf %28, %31 : vector<16x1xf32>
    %33 = math.rsqrt %32 : vector<16x1xf32>
    %34 = vector.broadcast %33 : vector<16x1xf32> to vector<16x32xf32>
    %35 = arith.mulf %30, %34 : vector<16x32xf32>
    %c0_9 = arith.constant 0 : index
    %c0_10 = arith.constant 0 : index
    %36 = vector.load %arg4[%c0_9, %c0_10] : memref<24x128xf32, #tpu.memory_space<vmem>>, vector<1x32xf32>
    %37 = vector.broadcast %36 : vector<1x32xf32> to vector<16x32xf32>
    %38 = arith.mulf %35, %37 : vector<16x32xf32>
    %c1 = arith.constant 1 : index
    %c0_11 = arith.constant 0 : index
    %39 = vector.load %arg4[%c1, %c0_11] : memref<24x128xf32, #tpu.memory_space<vmem>>, vector<1x32xf32>
    %40 = vector.broadcast %39 : vector<1x32xf32> to vector<16x32xf32>
    %41 = arith.addf %38, %40 : vector<16x32xf32>
    %c0_12 = arith.constant 0 : index
    %c0_13 = arith.constant 0 : index
    %42 = vector.load %arg1[%c0_12, %c0_13] : memref<1x16xi32, #tpu.memory_space<vmem>>, vector<1x16xi32>
    %c1_i32 = arith.constant 1 : i32
    %43 = vector.broadcast %c1_i32 : i32 to vector<1x16xi32>
    %44 = arith.cmpi ne, %42, %43 : vector<1x16xi32>
    %45 = tpu.iota {dimensions = array<i32: 0>} : vector<16x16xi32>
    %46 = tpu.iota {dimensions = array<i32: 1>} : vector<16x16xi32>
    %c3_i32 = arith.constant 3 : i32
    %47 = vector.broadcast %c3_i32 : i32 to vector<16x16xi32>
    %48 = arith.shrsi %45, %47 : vector<16x16xi32>
    %c3_i32_14 = arith.constant 3 : i32
    %49 = vector.broadcast %c3_i32_14 : i32 to vector<16x16xi32>
    %50 = arith.shrsi %46, %49 : vector<16x16xi32>
    %51 = arith.cmpi eq, %48, %50 : vector<16x16xi32>
    %52 = vector.broadcast %44 : vector<1x16xi1> to vector<16x16xi1>
    %53 = arith.andi %51, %52 : vector<16x16xi1>
    %cst_15 = arith.constant 0.000000e+00 : f32
    %cst_16 = arith.constant -1.000000e+09 : f32
    %54 = vector.broadcast %cst_15 : f32 to vector<16x16xf32>
    %55 = vector.broadcast %cst_16 : f32 to vector<16x16xf32>
    %56 = arith.select %53, %54, %55 : vector<16x16xi1>, vector<16x16xf32>
    %57 = arith.truncf %41 : vector<16x32xf32> to vector<16x32xbf16>
    %c80 = arith.constant 80 : index
    %c0_17 = arith.constant 0 : index
    %58 = vector.load %arg3[%c80, %c0_17] : memref<464x128xbf16, #tpu.memory_space<vmem>>, vector<32x96xbf16>
    %cst_18 = arith.constant dense<0.000000e+00> : vector<16x96xf32>
    %59 = tpu.matmul %57, %58, %cst_18 {dimension_numbers = #tpu.dot_dimension_numbers<[1], [0], [0], [1], [0, 0, 1, 1], [], []>} : vector<16x32xbf16>, vector<32x96xbf16>, vector<16x96xf32> -> vector<16x96xf32>
    %c2 = arith.constant 2 : index
    %c0_19 = arith.constant 0 : index
    %60 = vector.load %arg4[%c2, %c0_19] : memref<24x128xf32, #tpu.memory_space<vmem>>, vector<1x96xf32>
    %61 = vector.broadcast %60 : vector<1x96xf32> to vector<16x96xf32>
    %62 = arith.addf %59, %61 : vector<16x96xf32>
    %63 = vector.extract_strided_slice %62 {offsets = [0, 0], sizes = [16, 16], strides = [1, 1]} : vector<16x96xf32> to vector<16x16xf32>
    %64 = arith.truncf %63 : vector<16x16xf32> to vector<16x16xbf16>
    %65 = vector.extract_strided_slice %62 {offsets = [0, 32], sizes = [16, 16], strides = [1, 1]} : vector<16x96xf32> to vector<16x16xf32>
    %66 = arith.truncf %65 : vector<16x16xf32> to vector<16x16xbf16>
    %67 = vector.extract_strided_slice %62 {offsets = [0, 64], sizes = [16, 16], strides = [1, 1]} : vector<16x96xf32> to vector<16x16xf32>
    %68 = arith.truncf %67 : vector<16x16xf32> to vector<16x16xbf16>
    %cst_20 = arith.constant dense<0.000000e+00> : vector<16x16xf32>
    %69 = tpu.matmul %64, %66, %cst_20 {dimension_numbers = #tpu.dot_dimension_numbers<[1], [1], [0], [0], [0, 0, 1, 0], [], []>} : vector<16x16xbf16>, vector<16x16xbf16>, vector<16x16xf32> -> vector<16x16xf32>
    %cst_21 = arith.constant 2.500000e-01 : f32
    %70 = vector.broadcast %cst_21 : f32 to vector<16x16xf32>
    %71 = arith.mulf %69, %70 : vector<16x16xf32>
    %72 = arith.addf %71, %56 : vector<16x16xf32>
    %cst_22 = arith.constant dense<0xFF800000> : vector<16xf32>
    %73 = vector.multi_reduction <maximumf>, %72, %cst_22 [1] : vector<16x16xf32> to vector<16xf32>
    %74 = vector.shape_cast %73 : vector<16xf32> to vector<16x1xf32>
    %75 = vector.broadcast %74 : vector<16x1xf32> to vector<16x16xf32>
    %76 = arith.subf %72, %75 : vector<16x16xf32>
    %77 = math.exp %76 : vector<16x16xf32>
    %cst_23 = arith.constant dense<0.000000e+00> : vector<16xf32>
    %78 = vector.multi_reduction <add>, %77, %cst_23 [1] : vector<16x16xf32> to vector<16xf32>
    %79 = vector.shape_cast %78 : vector<16xf32> to vector<16x1xf32>
    %80 = tpu.reciprocal %79 {approx = true} : vector<16x1xf32> -> vector<16x1xf32>
    %81 = vector.broadcast %80 : vector<16x1xf32> to vector<16x16xf32>
    %82 = arith.mulf %77, %81 : vector<16x16xf32>
    %83 = arith.truncf %82 : vector<16x16xf32> to vector<16x16xbf16>
    %cst_24 = arith.constant dense<0.000000e+00> : vector<16x16xf32>
    %84 = tpu.matmul %83, %68, %cst_24 {dimension_numbers = #tpu.dot_dimension_numbers<[1], [0], [0], [1], [0, 0, 1, 1], [], []>} : vector<16x16xbf16>, vector<16x16xbf16>, vector<16x16xf32> -> vector<16x16xf32>
    %85 = vector.extract_strided_slice %62 {offsets = [0, 16], sizes = [16, 16], strides = [1, 1]} : vector<16x96xf32> to vector<16x16xf32>
    %86 = arith.truncf %85 : vector<16x16xf32> to vector<16x16xbf16>
    %87 = vector.extract_strided_slice %62 {offsets = [0, 48], sizes = [16, 16], strides = [1, 1]} : vector<16x96xf32> to vector<16x16xf32>
    %88 = arith.truncf %87 : vector<16x16xf32> to vector<16x16xbf16>
    %89 = vector.extract_strided_slice %62 {offsets = [0, 80], sizes = [16, 16], strides = [1, 1]} : vector<16x96xf32> to vector<16x16xf32>
    %90 = arith.truncf %89 : vector<16x16xf32> to vector<16x16xbf16>
    %cst_25 = arith.constant dense<0.000000e+00> : vector<16x16xf32>
    %91 = tpu.matmul %86, %88, %cst_25 {dimension_numbers = #tpu.dot_dimension_numbers<[1], [1], [0], [0], [0, 0, 1, 0], [], []>} : vector<16x16xbf16>, vector<16x16xbf16>, vector<16x16xf32> -> vector<16x16xf32>
    %cst_26 = arith.constant 2.500000e-01 : f32
    %92 = vector.broadcast %cst_26 : f32 to vector<16x16xf32>
    %93 = arith.mulf %91, %92 : vector<16x16xf32>
    %94 = arith.addf %93, %56 : vector<16x16xf32>
    %cst_27 = arith.constant dense<0xFF800000> : vector<16xf32>
    %95 = vector.multi_reduction <maximumf>, %94, %cst_27 [1] : vector<16x16xf32> to vector<16xf32>
    %96 = vector.shape_cast %95 : vector<16xf32> to vector<16x1xf32>
    %97 = vector.broadcast %96 : vector<16x1xf32> to vector<16x16xf32>
    %98 = arith.subf %94, %97 : vector<16x16xf32>
    %99 = math.exp %98 : vector<16x16xf32>
    %cst_28 = arith.constant dense<0.000000e+00> : vector<16xf32>
    %100 = vector.multi_reduction <add>, %99, %cst_28 [1] : vector<16x16xf32> to vector<16xf32>
    %101 = vector.shape_cast %100 : vector<16xf32> to vector<16x1xf32>
    %102 = tpu.reciprocal %101 {approx = true} : vector<16x1xf32> -> vector<16x1xf32>
    %103 = vector.broadcast %102 : vector<16x1xf32> to vector<16x16xf32>
    %104 = arith.mulf %99, %103 : vector<16x16xf32>
    %105 = arith.truncf %104 : vector<16x16xf32> to vector<16x16xbf16>
    %cst_29 = arith.constant dense<0.000000e+00> : vector<16x16xf32>
    %106 = tpu.matmul %105, %90, %cst_29 {dimension_numbers = #tpu.dot_dimension_numbers<[1], [0], [0], [1], [0, 0, 1, 1], [], []>} : vector<16x16xbf16>, vector<16x16xbf16>, vector<16x16xf32> -> vector<16x16xf32>
    %107 = tpu.concatenate %84, %106 in 1 : vector<16x16xf32>, vector<16x16xf32> -> vector<16x32xf32>
    %108 = arith.truncf %107 : vector<16x32xf32> to vector<16x32xbf16>
    %c112 = arith.constant 112 : index
    %c0_30 = arith.constant 0 : index
    %109 = vector.load %arg3[%c112, %c0_30] : memref<464x128xbf16, #tpu.memory_space<vmem>>, vector<32x32xbf16>
    %cst_31 = arith.constant dense<0.000000e+00> : vector<16x32xf32>
    %110 = tpu.matmul %108, %109, %cst_31 {dimension_numbers = #tpu.dot_dimension_numbers<[1], [0], [0], [1], [0, 0, 1, 1], [], []>} : vector<16x32xbf16>, vector<32x32xbf16>, vector<16x32xf32> -> vector<16x32xf32>
    %c3 = arith.constant 3 : index
    %c0_32 = arith.constant 0 : index
    %111 = vector.load %arg4[%c3, %c0_32] : memref<24x128xf32, #tpu.memory_space<vmem>>, vector<1x32xf32>
    %112 = vector.broadcast %111 : vector<1x32xf32> to vector<16x32xf32>
    %113 = arith.addf %110, %112 : vector<16x32xf32>
    %114 = arith.addf %41, %113 : vector<16x32xf32>
    %cst_33 = arith.constant dense<0.000000e+00> : vector<16xf32>
    %115 = vector.multi_reduction <add>, %114, %cst_33 [1] : vector<16x32xf32> to vector<16xf32>
    %116 = vector.shape_cast %115 : vector<16xf32> to vector<16x1xf32>
    %cst_34 = arith.constant 3.200000e+01 : f32
    %117 = vector.broadcast %cst_34 : f32 to vector<16x1xf32>
    %118 = arith.divf %116, %117 : vector<16x1xf32>
    %119 = vector.broadcast %118 : vector<16x1xf32> to vector<16x32xf32>
    %120 = arith.subf %114, %119 : vector<16x32xf32>
    %121 = vector.broadcast %118 : vector<16x1xf32> to vector<16x32xf32>
    %122 = arith.subf %114, %121 : vector<16x32xf32>
    %123 = arith.mulf %120, %122 : vector<16x32xf32>
    %cst_35 = arith.constant dense<0.000000e+00> : vector<16xf32>
    %124 = vector.multi_reduction <add>, %123, %cst_35 [1] : vector<16x32xf32> to vector<16xf32>
    %125 = vector.shape_cast %124 : vector<16xf32> to vector<16x1xf32>
    %cst_36 = arith.constant 3.200000e+01 : f32
    %126 = vector.broadcast %cst_36 : f32 to vector<16x1xf32>
    %127 = arith.divf %125, %126 : vector<16x1xf32>
    %128 = vector.broadcast %118 : vector<16x1xf32> to vector<16x32xf32>
    %129 = arith.subf %114, %128 : vector<16x32xf32>
    %cst_37 = arith.constant 9.99999974E-6 : f32
    %130 = vector.broadcast %cst_37 : f32 to vector<16x1xf32>
    %131 = arith.addf %127, %130 : vector<16x1xf32>
    %132 = math.rsqrt %131 : vector<16x1xf32>
    %133 = vector.broadcast %132 : vector<16x1xf32> to vector<16x32xf32>
    %134 = arith.mulf %129, %133 : vector<16x32xf32>
    %c4 = arith.constant 4 : index
    %c0_38 = arith.constant 0 : index
    %135 = vector.load %arg4[%c4, %c0_38] : memref<24x128xf32, #tpu.memory_space<vmem>>, vector<1x32xf32>
    %136 = vector.broadcast %135 : vector<1x32xf32> to vector<16x32xf32>
    %137 = arith.mulf %134, %136 : vector<16x32xf32>
    %c5 = arith.constant 5 : index
    %c0_39 = arith.constant 0 : index
    %138 = vector.load %arg4[%c5, %c0_39] : memref<24x128xf32, #tpu.memory_space<vmem>>, vector<1x32xf32>
    %139 = vector.broadcast %138 : vector<1x32xf32> to vector<16x32xf32>
    %140 = arith.addf %137, %139 : vector<16x32xf32>
    %141 = arith.truncf %140 : vector<16x32xf32> to vector<16x32xbf16>
    %c144 = arith.constant 144 : index
    %c0_40 = arith.constant 0 : index
    %142 = vector.load %arg3[%c144, %c0_40] : memref<464x128xbf16, #tpu.memory_space<vmem>>, vector<32x64xbf16>
    %cst_41 = arith.constant dense<0.000000e+00> : vector<16x64xf32>
    %143 = tpu.matmul %141, %142, %cst_41 {dimension_numbers = #tpu.dot_dimension_numbers<[1], [0], [0], [1], [0, 0, 1, 1], [], []>} : vector<16x32xbf16>, vector<32x64xbf16>, vector<16x64xf32> -> vector<16x64xf32>
    %c6 = arith.constant 6 : index
    %c0_42 = arith.constant 0 : index
    %144 = vector.load %arg4[%c6, %c0_42] : memref<24x128xf32, #tpu.memory_space<vmem>>, vector<1x64xf32>
    %145 = vector.broadcast %144 : vector<1x64xf32> to vector<16x64xf32>
    %146 = arith.addf %143, %145 : vector<16x64xf32>
    %cst_43 = arith.constant 5.000000e-01 : f32
    %147 = vector.broadcast %cst_43 : f32 to vector<16x64xf32>
    %148 = arith.mulf %147, %146 : vector<16x64xf32>
    %cst_44 = arith.constant 4.471500e-02 : f32
    %149 = vector.broadcast %cst_44 : f32 to vector<16x64xf32>
    %150 = arith.mulf %149, %146 : vector<16x64xf32>
    %151 = arith.mulf %150, %146 : vector<16x64xf32>
    %152 = arith.mulf %151, %146 : vector<16x64xf32>
    %153 = arith.addf %146, %152 : vector<16x64xf32>
    %cst_45 = arith.constant 0.797884583 : f32
    %154 = vector.broadcast %cst_45 : f32 to vector<16x64xf32>
    %155 = arith.mulf %154, %153 : vector<16x64xf32>
    %156 = math.tanh %155 : vector<16x64xf32>
    %cst_46 = arith.constant 1.000000e+00 : f32
    %157 = vector.broadcast %cst_46 : f32 to vector<16x64xf32>
    %158 = arith.addf %157, %156 : vector<16x64xf32>
    %159 = arith.mulf %148, %158 : vector<16x64xf32>
    %160 = arith.truncf %159 : vector<16x64xf32> to vector<16x64xbf16>
    %c176 = arith.constant 176 : index
    %c0_47 = arith.constant 0 : index
    %161 = vector.load %arg3[%c176, %c0_47] : memref<464x128xbf16, #tpu.memory_space<vmem>>, vector<64x32xbf16>
    %cst_48 = arith.constant dense<0.000000e+00> : vector<16x32xf32>
    %162 = tpu.matmul %160, %161, %cst_48 {dimension_numbers = #tpu.dot_dimension_numbers<[1], [0], [0], [1], [0, 0, 1, 1], [], []>} : vector<16x64xbf16>, vector<64x32xbf16>, vector<16x32xf32> -> vector<16x32xf32>
    %c7 = arith.constant 7 : index
    %c0_49 = arith.constant 0 : index
    %163 = vector.load %arg4[%c7, %c0_49] : memref<24x128xf32, #tpu.memory_space<vmem>>, vector<1x32xf32>
    %164 = vector.broadcast %163 : vector<1x32xf32> to vector<16x32xf32>
    %165 = arith.addf %162, %164 : vector<16x32xf32>
    %166 = arith.addf %140, %165 : vector<16x32xf32>
    %cst_50 = arith.constant dense<0.000000e+00> : vector<16xf32>
    %167 = vector.multi_reduction <add>, %166, %cst_50 [1] : vector<16x32xf32> to vector<16xf32>
    %168 = vector.shape_cast %167 : vector<16xf32> to vector<16x1xf32>
    %cst_51 = arith.constant 3.200000e+01 : f32
    %169 = vector.broadcast %cst_51 : f32 to vector<16x1xf32>
    %170 = arith.divf %168, %169 : vector<16x1xf32>
    %171 = vector.broadcast %170 : vector<16x1xf32> to vector<16x32xf32>
    %172 = arith.subf %166, %171 : vector<16x32xf32>
    %173 = vector.broadcast %170 : vector<16x1xf32> to vector<16x32xf32>
    %174 = arith.subf %166, %173 : vector<16x32xf32>
    %175 = arith.mulf %172, %174 : vector<16x32xf32>
    %cst_52 = arith.constant dense<0.000000e+00> : vector<16xf32>
    %176 = vector.multi_reduction <add>, %175, %cst_52 [1] : vector<16x32xf32> to vector<16xf32>
    %177 = vector.shape_cast %176 : vector<16xf32> to vector<16x1xf32>
    %cst_53 = arith.constant 3.200000e+01 : f32
    %178 = vector.broadcast %cst_53 : f32 to vector<16x1xf32>
    %179 = arith.divf %177, %178 : vector<16x1xf32>
    %180 = vector.broadcast %170 : vector<16x1xf32> to vector<16x32xf32>
    %181 = arith.subf %166, %180 : vector<16x32xf32>
    %cst_54 = arith.constant 9.99999974E-6 : f32
    %182 = vector.broadcast %cst_54 : f32 to vector<16x1xf32>
    %183 = arith.addf %179, %182 : vector<16x1xf32>
    %184 = math.rsqrt %183 : vector<16x1xf32>
    %185 = vector.broadcast %184 : vector<16x1xf32> to vector<16x32xf32>
    %186 = arith.mulf %181, %185 : vector<16x32xf32>
    %c8 = arith.constant 8 : index
    %c0_55 = arith.constant 0 : index
    %187 = vector.load %arg4[%c8, %c0_55] : memref<24x128xf32, #tpu.memory_space<vmem>>, vector<1x32xf32>
    %188 = vector.broadcast %187 : vector<1x32xf32> to vector<16x32xf32>
    %189 = arith.mulf %186, %188 : vector<16x32xf32>
    %c9 = arith.constant 9 : index
    %c0_56 = arith.constant 0 : index
    %190 = vector.load %arg4[%c9, %c0_56] : memref<24x128xf32, #tpu.memory_space<vmem>>, vector<1x32xf32>
    %191 = vector.broadcast %190 : vector<1x32xf32> to vector<16x32xf32>
    %192 = arith.addf %189, %191 : vector<16x32xf32>
    %193 = arith.truncf %192 : vector<16x32xf32> to vector<16x32xbf16>
    %c240 = arith.constant 240 : index
    %c0_57 = arith.constant 0 : index
    %194 = vector.load %arg3[%c240, %c0_57] : memref<464x128xbf16, #tpu.memory_space<vmem>>, vector<32x96xbf16>
    %cst_58 = arith.constant dense<0.000000e+00> : vector<16x96xf32>
    %195 = tpu.matmul %193, %194, %cst_58 {dimension_numbers = #tpu.dot_dimension_numbers<[1], [0], [0], [1], [0, 0, 1, 1], [], []>} : vector<16x32xbf16>, vector<32x96xbf16>, vector<16x96xf32> -> vector<16x96xf32>
    %c10 = arith.constant 10 : index
    %c0_59 = arith.constant 0 : index
    %196 = vector.load %arg4[%c10, %c0_59] : memref<24x128xf32, #tpu.memory_space<vmem>>, vector<1x96xf32>
    %197 = vector.broadcast %196 : vector<1x96xf32> to vector<16x96xf32>
    %198 = arith.addf %195, %197 : vector<16x96xf32>
    %199 = vector.extract_strided_slice %198 {offsets = [0, 0], sizes = [16, 16], strides = [1, 1]} : vector<16x96xf32> to vector<16x16xf32>
    %200 = arith.truncf %199 : vector<16x16xf32> to vector<16x16xbf16>
    %201 = vector.extract_strided_slice %198 {offsets = [0, 32], sizes = [16, 16], strides = [1, 1]} : vector<16x96xf32> to vector<16x16xf32>
    %202 = arith.truncf %201 : vector<16x16xf32> to vector<16x16xbf16>
    %203 = vector.extract_strided_slice %198 {offsets = [0, 64], sizes = [16, 16], strides = [1, 1]} : vector<16x96xf32> to vector<16x16xf32>
    %204 = arith.truncf %203 : vector<16x16xf32> to vector<16x16xbf16>
    %cst_60 = arith.constant dense<0.000000e+00> : vector<16x16xf32>
    %205 = tpu.matmul %200, %202, %cst_60 {dimension_numbers = #tpu.dot_dimension_numbers<[1], [1], [0], [0], [0, 0, 1, 0], [], []>} : vector<16x16xbf16>, vector<16x16xbf16>, vector<16x16xf32> -> vector<16x16xf32>
    %cst_61 = arith.constant 2.500000e-01 : f32
    %206 = vector.broadcast %cst_61 : f32 to vector<16x16xf32>
    %207 = arith.mulf %205, %206 : vector<16x16xf32>
    %208 = arith.addf %207, %56 : vector<16x16xf32>
    %cst_62 = arith.constant dense<0xFF800000> : vector<16xf32>
    %209 = vector.multi_reduction <maximumf>, %208, %cst_62 [1] : vector<16x16xf32> to vector<16xf32>
    %210 = vector.shape_cast %209 : vector<16xf32> to vector<16x1xf32>
    %211 = vector.broadcast %210 : vector<16x1xf32> to vector<16x16xf32>
    %212 = arith.subf %208, %211 : vector<16x16xf32>
    %213 = math.exp %212 : vector<16x16xf32>
    %cst_63 = arith.constant dense<0.000000e+00> : vector<16xf32>
    %214 = vector.multi_reduction <add>, %213, %cst_63 [1] : vector<16x16xf32> to vector<16xf32>
    %215 = vector.shape_cast %214 : vector<16xf32> to vector<16x1xf32>
    %216 = tpu.reciprocal %215 {approx = true} : vector<16x1xf32> -> vector<16x1xf32>
    %217 = vector.broadcast %216 : vector<16x1xf32> to vector<16x16xf32>
    %218 = arith.mulf %213, %217 : vector<16x16xf32>
    %219 = arith.truncf %218 : vector<16x16xf32> to vector<16x16xbf16>
    %cst_64 = arith.constant dense<0.000000e+00> : vector<16x16xf32>
    %220 = tpu.matmul %219, %204, %cst_64 {dimension_numbers = #tpu.dot_dimension_numbers<[1], [0], [0], [1], [0, 0, 1, 1], [], []>} : vector<16x16xbf16>, vector<16x16xbf16>, vector<16x16xf32> -> vector<16x16xf32>
    %221 = vector.extract_strided_slice %198 {offsets = [0, 16], sizes = [16, 16], strides = [1, 1]} : vector<16x96xf32> to vector<16x16xf32>
    %222 = arith.truncf %221 : vector<16x16xf32> to vector<16x16xbf16>
    %223 = vector.extract_strided_slice %198 {offsets = [0, 48], sizes = [16, 16], strides = [1, 1]} : vector<16x96xf32> to vector<16x16xf32>
    %224 = arith.truncf %223 : vector<16x16xf32> to vector<16x16xbf16>
    %225 = vector.extract_strided_slice %198 {offsets = [0, 80], sizes = [16, 16], strides = [1, 1]} : vector<16x96xf32> to vector<16x16xf32>
    %226 = arith.truncf %225 : vector<16x16xf32> to vector<16x16xbf16>
    %cst_65 = arith.constant dense<0.000000e+00> : vector<16x16xf32>
    %227 = tpu.matmul %222, %224, %cst_65 {dimension_numbers = #tpu.dot_dimension_numbers<[1], [1], [0], [0], [0, 0, 1, 0], [], []>} : vector<16x16xbf16>, vector<16x16xbf16>, vector<16x16xf32> -> vector<16x16xf32>
    %cst_66 = arith.constant 2.500000e-01 : f32
    %228 = vector.broadcast %cst_66 : f32 to vector<16x16xf32>
    %229 = arith.mulf %227, %228 : vector<16x16xf32>
    %230 = arith.addf %229, %56 : vector<16x16xf32>
    %cst_67 = arith.constant dense<0xFF800000> : vector<16xf32>
    %231 = vector.multi_reduction <maximumf>, %230, %cst_67 [1] : vector<16x16xf32> to vector<16xf32>
    %232 = vector.shape_cast %231 : vector<16xf32> to vector<16x1xf32>
    %233 = vector.broadcast %232 : vector<16x1xf32> to vector<16x16xf32>
    %234 = arith.subf %230, %233 : vector<16x16xf32>
    %235 = math.exp %234 : vector<16x16xf32>
    %cst_68 = arith.constant dense<0.000000e+00> : vector<16xf32>
    %236 = vector.multi_reduction <add>, %235, %cst_68 [1] : vector<16x16xf32> to vector<16xf32>
    %237 = vector.shape_cast %236 : vector<16xf32> to vector<16x1xf32>
    %238 = tpu.reciprocal %237 {approx = true} : vector<16x1xf32> -> vector<16x1xf32>
    %239 = vector.broadcast %238 : vector<16x1xf32> to vector<16x16xf32>
    %240 = arith.mulf %235, %239 : vector<16x16xf32>
    %241 = arith.truncf %240 : vector<16x16xf32> to vector<16x16xbf16>
    %cst_69 = arith.constant dense<0.000000e+00> : vector<16x16xf32>
    %242 = tpu.matmul %241, %226, %cst_69 {dimension_numbers = #tpu.dot_dimension_numbers<[1], [0], [0], [1], [0, 0, 1, 1], [], []>} : vector<16x16xbf16>, vector<16x16xbf16>, vector<16x16xf32> -> vector<16x16xf32>
    %243 = tpu.concatenate %220, %242 in 1 : vector<16x16xf32>, vector<16x16xf32> -> vector<16x32xf32>
    %244 = arith.truncf %243 : vector<16x32xf32> to vector<16x32xbf16>
    %c272 = arith.constant 272 : index
    %c0_70 = arith.constant 0 : index
    %245 = vector.load %arg3[%c272, %c0_70] : memref<464x128xbf16, #tpu.memory_space<vmem>>, vector<32x32xbf16>
    %cst_71 = arith.constant dense<0.000000e+00> : vector<16x32xf32>
    %246 = tpu.matmul %244, %245, %cst_71 {dimension_numbers = #tpu.dot_dimension_numbers<[1], [0], [0], [1], [0, 0, 1, 1], [], []>} : vector<16x32xbf16>, vector<32x32xbf16>, vector<16x32xf32> -> vector<16x32xf32>
    %c11 = arith.constant 11 : index
    %c0_72 = arith.constant 0 : index
    %247 = vector.load %arg4[%c11, %c0_72] : memref<24x128xf32, #tpu.memory_space<vmem>>, vector<1x32xf32>
    %248 = vector.broadcast %247 : vector<1x32xf32> to vector<16x32xf32>
    %249 = arith.addf %246, %248 : vector<16x32xf32>
    %250 = arith.addf %192, %249 : vector<16x32xf32>
    %cst_73 = arith.constant dense<0.000000e+00> : vector<16xf32>
    %251 = vector.multi_reduction <add>, %250, %cst_73 [1] : vector<16x32xf32> to vector<16xf32>
    %252 = vector.shape_cast %251 : vector<16xf32> to vector<16x1xf32>
    %cst_74 = arith.constant 3.200000e+01 : f32
    %253 = vector.broadcast %cst_74 : f32 to vector<16x1xf32>
    %254 = arith.divf %252, %253 : vector<16x1xf32>
    %255 = vector.broadcast %254 : vector<16x1xf32> to vector<16x32xf32>
    %256 = arith.subf %250, %255 : vector<16x32xf32>
    %257 = vector.broadcast %254 : vector<16x1xf32> to vector<16x32xf32>
    %258 = arith.subf %250, %257 : vector<16x32xf32>
    %259 = arith.mulf %256, %258 : vector<16x32xf32>
    %cst_75 = arith.constant dense<0.000000e+00> : vector<16xf32>
    %260 = vector.multi_reduction <add>, %259, %cst_75 [1] : vector<16x32xf32> to vector<16xf32>
    %261 = vector.shape_cast %260 : vector<16xf32> to vector<16x1xf32>
    %cst_76 = arith.constant 3.200000e+01 : f32
    %262 = vector.broadcast %cst_76 : f32 to vector<16x1xf32>
    %263 = arith.divf %261, %262 : vector<16x1xf32>
    %264 = vector.broadcast %254 : vector<16x1xf32> to vector<16x32xf32>
    %265 = arith.subf %250, %264 : vector<16x32xf32>
    %cst_77 = arith.constant 9.99999974E-6 : f32
    %266 = vector.broadcast %cst_77 : f32 to vector<16x1xf32>
    %267 = arith.addf %263, %266 : vector<16x1xf32>
    %268 = math.rsqrt %267 : vector<16x1xf32>
    %269 = vector.broadcast %268 : vector<16x1xf32> to vector<16x32xf32>
    %270 = arith.mulf %265, %269 : vector<16x32xf32>
    %c12 = arith.constant 12 : index
    %c0_78 = arith.constant 0 : index
    %271 = vector.load %arg4[%c12, %c0_78] : memref<24x128xf32, #tpu.memory_space<vmem>>, vector<1x32xf32>
    %272 = vector.broadcast %271 : vector<1x32xf32> to vector<16x32xf32>
    %273 = arith.mulf %270, %272 : vector<16x32xf32>
    %c13 = arith.constant 13 : index
    %c0_79 = arith.constant 0 : index
    %274 = vector.load %arg4[%c13, %c0_79] : memref<24x128xf32, #tpu.memory_space<vmem>>, vector<1x32xf32>
    %275 = vector.broadcast %274 : vector<1x32xf32> to vector<16x32xf32>
    %276 = arith.addf %273, %275 : vector<16x32xf32>
    %277 = arith.truncf %276 : vector<16x32xf32> to vector<16x32xbf16>
    %c304 = arith.constant 304 : index
    %c0_80 = arith.constant 0 : index
    %278 = vector.load %arg3[%c304, %c0_80] : memref<464x128xbf16, #tpu.memory_space<vmem>>, vector<32x64xbf16>
    %cst_81 = arith.constant dense<0.000000e+00> : vector<16x64xf32>
    %279 = tpu.matmul %277, %278, %cst_81 {dimension_numbers = #tpu.dot_dimension_numbers<[1], [0], [0], [1], [0, 0, 1, 1], [], []>} : vector<16x32xbf16>, vector<32x64xbf16>, vector<16x64xf32> -> vector<16x64xf32>
    %c14 = arith.constant 14 : index
    %c0_82 = arith.constant 0 : index
    %280 = vector.load %arg4[%c14, %c0_82] : memref<24x128xf32, #tpu.memory_space<vmem>>, vector<1x64xf32>
    %281 = vector.broadcast %280 : vector<1x64xf32> to vector<16x64xf32>
    %282 = arith.addf %279, %281 : vector<16x64xf32>
    %cst_83 = arith.constant 5.000000e-01 : f32
    %283 = vector.broadcast %cst_83 : f32 to vector<16x64xf32>
    %284 = arith.mulf %283, %282 : vector<16x64xf32>
    %cst_84 = arith.constant 4.471500e-02 : f32
    %285 = vector.broadcast %cst_84 : f32 to vector<16x64xf32>
    %286 = arith.mulf %285, %282 : vector<16x64xf32>
    %287 = arith.mulf %286, %282 : vector<16x64xf32>
    %288 = arith.mulf %287, %282 : vector<16x64xf32>
    %289 = arith.addf %282, %288 : vector<16x64xf32>
    %cst_85 = arith.constant 0.797884583 : f32
    %290 = vector.broadcast %cst_85 : f32 to vector<16x64xf32>
    %291 = arith.mulf %290, %289 : vector<16x64xf32>
    %292 = math.tanh %291 : vector<16x64xf32>
    %cst_86 = arith.constant 1.000000e+00 : f32
    %293 = vector.broadcast %cst_86 : f32 to vector<16x64xf32>
    %294 = arith.addf %293, %292 : vector<16x64xf32>
    %295 = arith.mulf %284, %294 : vector<16x64xf32>
    %296 = arith.truncf %295 : vector<16x64xf32> to vector<16x64xbf16>
    %c336 = arith.constant 336 : index
    %c0_87 = arith.constant 0 : index
    %297 = vector.load %arg3[%c336, %c0_87] : memref<464x128xbf16, #tpu.memory_space<vmem>>, vector<64x32xbf16>
    %cst_88 = arith.constant dense<0.000000e+00> : vector<16x32xf32>
    %298 = tpu.matmul %296, %297, %cst_88 {dimension_numbers = #tpu.dot_dimension_numbers<[1], [0], [0], [1], [0, 0, 1, 1], [], []>} : vector<16x64xbf16>, vector<64x32xbf16>, vector<16x32xf32> -> vector<16x32xf32>
    %c15 = arith.constant 15 : index
    %c0_89 = arith.constant 0 : index
    %299 = vector.load %arg4[%c15, %c0_89] : memref<24x128xf32, #tpu.memory_space<vmem>>, vector<1x32xf32>
    %300 = vector.broadcast %299 : vector<1x32xf32> to vector<16x32xf32>
    %301 = arith.addf %298, %300 : vector<16x32xf32>
    %302 = arith.addf %276, %301 : vector<16x32xf32>
    %cst_90 = arith.constant dense<0.000000e+00> : vector<16xf32>
    %303 = vector.multi_reduction <add>, %302, %cst_90 [1] : vector<16x32xf32> to vector<16xf32>
    %304 = vector.shape_cast %303 : vector<16xf32> to vector<16x1xf32>
    %cst_91 = arith.constant 3.200000e+01 : f32
    %305 = vector.broadcast %cst_91 : f32 to vector<16x1xf32>
    %306 = arith.divf %304, %305 : vector<16x1xf32>
    %307 = vector.broadcast %306 : vector<16x1xf32> to vector<16x32xf32>
    %308 = arith.subf %302, %307 : vector<16x32xf32>
    %309 = vector.broadcast %306 : vector<16x1xf32> to vector<16x32xf32>
    %310 = arith.subf %302, %309 : vector<16x32xf32>
    %311 = arith.mulf %308, %310 : vector<16x32xf32>
    %cst_92 = arith.constant dense<0.000000e+00> : vector<16xf32>
    %312 = vector.multi_reduction <add>, %311, %cst_92 [1] : vector<16x32xf32> to vector<16xf32>
    %313 = vector.shape_cast %312 : vector<16xf32> to vector<16x1xf32>
    %cst_93 = arith.constant 3.200000e+01 : f32
    %314 = vector.broadcast %cst_93 : f32 to vector<16x1xf32>
    %315 = arith.divf %313, %314 : vector<16x1xf32>
    %316 = vector.broadcast %306 : vector<16x1xf32> to vector<16x32xf32>
    %317 = arith.subf %302, %316 : vector<16x32xf32>
    %cst_94 = arith.constant 9.99999974E-6 : f32
    %318 = vector.broadcast %cst_94 : f32 to vector<16x1xf32>
    %319 = arith.addf %315, %318 : vector<16x1xf32>
    %320 = math.rsqrt %319 : vector<16x1xf32>
    %321 = vector.broadcast %320 : vector<16x1xf32> to vector<16x32xf32>
    %322 = arith.mulf %317, %321 : vector<16x32xf32>
    %c16 = arith.constant 16 : index
    %c0_95 = arith.constant 0 : index
    %323 = vector.load %arg4[%c16, %c0_95] : memref<24x128xf32, #tpu.memory_space<vmem>>, vector<1x32xf32>
    %324 = vector.broadcast %323 : vector<1x32xf32> to vector<16x32xf32>
    %325 = arith.mulf %322, %324 : vector<16x32xf32>
    %c17 = arith.constant 17 : index
    %c0_96 = arith.constant 0 : index
    %326 = vector.load %arg4[%c17, %c0_96] : memref<24x128xf32, #tpu.memory_space<vmem>>, vector<1x32xf32>
    %327 = vector.broadcast %326 : vector<1x32xf32> to vector<16x32xf32>
    %328 = arith.addf %325, %327 : vector<16x32xf32>
    %329 = vector.shape_cast %328 : vector<16x32xf32> to vector<2x8x32xf32>
    %330 = vector.extract_strided_slice %329 {offsets = [0, 0, 0], sizes = [2, 1, 32], strides = [1, 1, 1]} : vector<2x8x32xf32> to vector<2x1x32xf32>
    %331 = vector.shape_cast %330 : vector<2x1x32xf32> to vector<2x32xf32>
    %332 = arith.truncf %331 : vector<2x32xf32> to vector<2x32xbf16>
    %c400 = arith.constant 400 : index
    %c0_97 = arith.constant 0 : index
    %333 = vector.load %arg3[%c400, %c0_97] : memref<464x128xbf16, #tpu.memory_space<vmem>>, vector<32x32xbf16>
    %cst_98 = arith.constant dense<0.000000e+00> : vector<2x32xf32>
    %334 = tpu.matmul %332, %333, %cst_98 {dimension_numbers = #tpu.dot_dimension_numbers<[1], [0], [0], [1], [0, 0, 1, 1], [], []>} : vector<2x32xbf16>, vector<32x32xbf16>, vector<2x32xf32> -> vector<2x32xf32>
    %c18 = arith.constant 18 : index
    %c0_99 = arith.constant 0 : index
    %335 = vector.load %arg4[%c18, %c0_99] : memref<24x128xf32, #tpu.memory_space<vmem>>, vector<1x32xf32>
    %336 = vector.broadcast %335 : vector<1x32xf32> to vector<2x32xf32>
    %337 = arith.addf %334, %336 : vector<2x32xf32>
    %338 = math.tanh %337 : vector<2x32xf32>
    %339 = arith.truncf %338 : vector<2x32xf32> to vector<2x32xbf16>
    %c432 = arith.constant 432 : index
    %c0_100 = arith.constant 0 : index
    %340 = vector.load %arg3[%c432, %c0_100] : memref<464x128xbf16, #tpu.memory_space<vmem>>, vector<32x2xbf16>
    %cst_101 = arith.constant dense<0.000000e+00> : vector<2x2xf32>
    %341 = tpu.matmul %339, %340, %cst_101 {dimension_numbers = #tpu.dot_dimension_numbers<[1], [0], [0], [1], [0, 0, 1, 1], [], []>} : vector<2x32xbf16>, vector<32x2xbf16>, vector<2x2xf32> -> vector<2x2xf32>
    %c19 = arith.constant 19 : index
    %c0_102 = arith.constant 0 : index
    %342 = vector.load %arg4[%c19, %c0_102] : memref<24x128xf32, #tpu.memory_space<vmem>>, vector<1x2xf32>
    %343 = vector.broadcast %342 : vector<1x2xf32> to vector<2x2xf32>
    %344 = arith.addf %341, %343 : vector<2x2xf32>
    %cst_103 = arith.constant dense<0xFF800000> : vector<2xf32>
    %345 = vector.multi_reduction <maximumf>, %344, %cst_103 [1] : vector<2x2xf32> to vector<2xf32>
    %346 = vector.shape_cast %345 : vector<2xf32> to vector<2x1xf32>
    %347 = vector.broadcast %346 : vector<2x1xf32> to vector<2x2xf32>
    %348 = arith.subf %344, %347 : vector<2x2xf32>
    %349 = math.exp %348 : vector<2x2xf32>
    %cst_104 = arith.constant dense<0.000000e+00> : vector<2xf32>
    %350 = vector.multi_reduction <add>, %349, %cst_104 [1] : vector<2x2xf32> to vector<2xf32>
    %351 = vector.shape_cast %350 : vector<2xf32> to vector<2x1xf32>
    %352 = tpu.reciprocal %351 {approx = true} : vector<2x1xf32> -> vector<2x1xf32>
    %353 = vector.broadcast %352 : vector<2x1xf32> to vector<2x2xf32>
    %354 = arith.mulf %349, %353 : vector<2x2xf32>
    %c0_105 = arith.constant 0 : index
    %c0_106 = arith.constant 0 : index
    %355 = vector.load %arg2[%c0_105, %c0_106] : memref<2x1xi32, #tpu.memory_space<vmem>>, vector<2x1xi32>
    %356 = tpu.iota {dimensions = array<i32: 1>} : vector<2x2xi32>
    %357 = vector.broadcast %355 : vector<2x1xi32> to vector<2x2xi32>
    %358 = arith.cmpi eq, %356, %357 : vector<2x2xi32>
    %359 = arith.extui %358 : vector<2x2xi1> to vector<2x2xi32>
    %360 = arith.sitofp %359 : vector<2x2xi32> to vector<2x2xf32>
    %361 = vector.broadcast %346 : vector<2x1xf32> to vector<2x2xf32>
    %362 = arith.subf %344, %361 : vector<2x2xf32>
    %363 = math.log %351 : vector<2x1xf32>
    %364 = vector.broadcast %363 : vector<2x1xf32> to vector<2x2xf32>
    %365 = arith.subf %362, %364 : vector<2x2xf32>
    %366 = arith.mulf %360, %365 : vector<2x2xf32>
    %cst_107 = arith.constant dense<0.000000e+00> : vector<2xf32>
    %367 = vector.multi_reduction <add>, %366, %cst_107 [1] : vector<2x2xf32> to vector<2xf32>
    %368 = vector.shape_cast %367 : vector<2xf32> to vector<2x1xf32>
    %cst_108 = arith.constant 0.000000e+00 : f32
    %369 = vector.broadcast %cst_108 : f32 to vector<2x1xf32>
    %370 = arith.subf %369, %368 : vector<2x1xf32>
    %cst_109 = arith.constant dense<0.000000e+00> : vector<1xf32>
    %371 = vector.multi_reduction <add>, %370, %cst_109 [0] : vector<2x1xf32> to vector<1xf32>
    %372 = vector.shape_cast %371 : vector<1xf32> to vector<1x1xf32>
    %cst_110 = arith.constant 5.000000e-01 : f32
    %373 = vector.broadcast %cst_110 : f32 to vector<1x1xf32>
    %374 = arith.mulf %372, %373 : vector<1x1xf32>
    %375 = vector.shape_cast %374 : vector<1x1xf32> to vector<1x1xf32>
    %376 = vector.broadcast %375 : vector<1x1xf32> to vector<2x1xf32>
    %377 = tpu.concatenate %354, %376 in 1 : vector<2x2xf32>, vector<2x1xf32> -> vector<2x3xf32>
    %cst_111 = arith.constant 0.000000e+00 : f32
    %378 = vector.broadcast %cst_111 : f32 to vector<2x125xf32>
    %379 = tpu.concatenate %377, %378 in 1 : vector<2x3xf32>, vector<2x125xf32> -> vector<2x128xf32>
    %cst_112 = arith.constant 0.000000e+00 : f32
    %380 = vector.broadcast %cst_112 : f32 to vector<6x128xf32>
    %381 = tpu.concatenate %379, %380 in 0 : vector<2x128xf32>, vector<6x128xf32> -> vector<8x128xf32>
    %c0_113 = arith.constant 0 : index
    %c0_114 = arith.constant 0 : index
    %382 = vector.load %arg5[%c0_113, %c0_114] : memref<8x128xf32, #tpu.memory_space<vmem>>, vector<8x128xf32>
    tpu.vector_store %arg5[%c0_113, %c0_114], %381 {strides = array<i32>} : memref<8x128xf32, #tpu.memory_space<vmem>>, vector<8x128xf32>,
    return
  }
}

</mosaic_0001>

<bundles_post_ra>
// kernel: tpu_custom_call.1
= control target key start
LH: loop header
LB: loop body
LE: loop exit
PB: predicated region body
PF: predicated region fallthrough
CT: control target
= control target key end

     0   :  { %10 = vsyncpa [#allocation3], 0  ;;  %s2479_s0 = inlined_call_operand.vmem [shape: s32[16,1], index: 0, kind: input, shape index: {}]   ;;  %s2480_s1 = inlined_call_operand.vmem [shape: s32[1,16], index: 1, kind: input, shape index: {}]   ;;  %s2481_s2 = inlined_call_operand.vmem [shape: s32[2,1], index: 2, kind: input, shape index: {}]   ;;  %s2482_s3 = inlined_call_operand.hbm [shape: bf16[464,128], index: 3, kind: input, shape index: {}]   ;;  %s2483_s4 = inlined_call_operand.vmem [shape: f32[24,128], index: 4, kind: input, shape index: {}]   ;;  %s2484_s5 = inlined_call_operand.hbm [shape: f32[8,128], index: 5, kind: output, shape index: {}]  }
   0x1   :  { %11 = vsyncpa [#allocation4], 0  ;;  %s2119_s18 = smov [#allocation2]   ;;  %s2071_s22 = scalar_lea.hbm %s2482_s3, 3712 }
   0x2   :  { %s23_s19 = sshll.u32 %s2119_s18, 4  ;;  %p2072_p0 = scmp.ne.s32.totalorder %s2482_s3, %s2071_s22  ;;  %s24_s19 = int_to_ptr.vmem [resolvable:$true] %s23_s19 }
   0x3   :  { %p2075_p1 = scmp.lt.u32.totalorder %s2071_s22, %s2482_s3 }
   0x5   :  { %p2077_p2 = pnand %p2075_p1, %p2072_p0 }
   0x7   :  { %2080 = shalt.err (!%p2077_p2)
}
   0x8   :  { %s2081_s27 = scalar_lea.vmem %s24_s19, 3712  ;;  %p2086_p4 = scmp.lt.s32.totalorder %s24_s19, %s24_s19 }
   0x9   :  { %p2082_p3 = scmp.ne.s32.totalorder %s24_s19, %s2081_s27  ;;  %p2087_p5 = scmp.lt.s32.totalorder %s2081_s27, %s2081_s27 }
   0xb   :  { %p2088_p6 = por %p2087_p5, %p2086_p4 }
   0xd   :  { %p2089_p7 = pnand %p2088_p6, %p2082_p3 }
   0xf   :  { %2092 = shalt.err (!%p2089_p7)
}
  0x10   :  { %s2120_s28 = smov 64   ;;  %s2121_s29 = smov 4  }
  0x11   :  { %29 = dma.hbm_to_vmem [thread:$0]  %s2482_s3, 3712, %s24_s19, [#allocation3], %s2120_s28, %s2120_s28, %s2121_s29  }
  0x12   :  { %2115 = dma.done.wait [#allocation3], 3712  }
  0x13   :  { %2116 = vsyncadd [#allocation3], 4294963584  ;;  %v38_v0 = vlaneseq  ;;  %v2122_v1 = vmov 0   ;;  %v2123_v2 = vmov 0.0   ;;  %v176_v9 = vld [vmem:[%s2480_s1] sm:$0x1] }
  0x14   :  { %1964 = vset.pattern.permute.xlu0 %v2122_v1  ;;  %1803 = vmatprep.subr.bf16.mxu0 %v2123_v2  ;;  %v36_v11 = vld [vmem:[%s2479_s0] sm:$0xff]  ;;  %vm177_vm0 = vcmp.ne.s32.totalorder %v176_v9, 1  ;;  %v37_v14 = vld [vmem:[%s2479_s0 + $0x8] sm:$0xff]  ;;  %v1977_v19 = vld [vmem:[#allocation2 + $0x10] sm:$0xff]   ;;  %vm2124_vm6 = vmmov 0   ;;  %vm85_vm9 = vcmask 523264  }
  0x15   :  { %v179_v3 = vshrl.u32 %v38_v0, 7  ;;  %1815 = vmatprep.subr.bf16.mxu1 %v2123_v2  ;;  %v2178_v4 = vand.u32 127, %v38_v0  ;;  %41 = vperm.xlu0 %1964, %v36_v11   ;;  %v1975_v12 = vld [vmem:[#allocation2] sm:$0xff]   ;;  %v186_v13 = vsel %vm177_vm0, 1, %v2122_v1  ;;  %v1976_v16 = vld [vmem:[#allocation2 + $0x8] sm:$0xff]   ;;  %v1978_v20 = vld [vmem:[#allocation2 + $0x18] sm:$0xff]  }
  0x16   :  { %1804 = vmatpush3.bf16.msra.mxu0 %v1975_v12  ;;  %1811 = vmatprep.mubr.msk.bf16.mxu0 %vm2124_vm6, %v2123_v2  ;;  %v130_v26 = vld [vmem:[#allocation2 + $0x20] sm:$0xf]  ;;  %vm134_vm10 = vcmask 261120   ;;  %v1979_v46 = vld [vmem:[#allocation2 + $0x28] sm:$0xff]   ;;  %v1980_v47 = vld [vmem:[#allocation2 + $0x30] sm:$0xff]   ;;  %s2125_s16 = smov 96  }
  0x17   :  { %v180_v5 = vadd.s32 8, %v179_v3  ;;  %v181_v6 = vshra.s32 %v179_v3, 3  ;;  %v183_v7 = vshra.s32 %v2178_v4, 3  ;;  %v189_v8 = vsub.s32 0, %v179_v3  ;;  %1805 = vmatprep.subr.bf16.mxu0 %v2123_v2  ;;  %1819 = vmatprep.mubr.msk.bf16.mxu1 %vm2124_vm6, %v2123_v2  ;;  %v1685_v56 = vld [vmem:[%s2483_s4] ss:$0 sm:$0xff] }
  0x18   :  { %v131_v27 = vunpack.c.l.bf16 %v130_v26  ;;  %1816 = vmatpush3.bf16.msra.mxu1 %v1979_v46  ;;  %v1686_v60 = vld [vmem:[%s2483_s4 + $0x1] ss:$0 sm:$0xff]  ;;  %v1687_v1 = vld [vmem:[%s2483_s4 + $0x2] ss:$0 sm:$0xff]  ;;  %s2126_s17 = smov 80   ;;  %s2127_s18 = smov 112  }
  0x19   :  { %v182_v10 = vshra.s32 %v180_v5, 3  ;;  %vm184_vm1 = vcmp.eq.s32.totalorder %v181_v6, %v183_v7  ;;  %v190_v15 = vrot.slane %v186_v13, %v189_v8  ;;  %44 = vperm.xlu0 %1964, %v37_v14   ;;  %1817 = vmatprep.subr.bf16.mxu1 %v2123_v2  ;;  %vm266_vm11 = vcmask 130048   ;;  %s2129_s19 = smov 48   ;;  %s2130_s20 = smov 16  }
  0x1a   :  { %1806 = vmatpush3.bf16.msra.mxu0 %v1976_v16  ;;  %v2128_v16 = vmov -1e+09   ;;  %vm1497_vm12 = vcmask 1041409   ;;  %vm1621_vm13 = vcmask 9216   ;;  %vm1648_vm15 = vcmask 1041408  }
  0x1b   :  { %vm185_vm2 = vcmp.eq.s32.totalorder %v182_v10, %v183_v7  ;;  %vm191_vm3 = vcmp.eq.s32.totalorder %v190_v15, 1  ;;  %1807 = vmatprep.subr.bf16.mxu0 %v2123_v2  ;;  %vm1657_vm0 = vcmask 15360  }
  0x1c   :  { %vm2191_vm4 = vmand %vm184_vm1, %vm191_vm3  ;;  %1818 = vmatpush3.bf16.msra.mxu1 %v1980_v47  ;;  %vm1659_vm1 = vcmask 23552  }
  0x1d   :  { %vm2195_vm5 = vmand %vm185_vm2, %vm191_vm3  ;;  %1823 = vmatprep.subr.bf16.mxu1 %v2123_v2 }
  0x1e   :  { %1808 = vmatpush3.bf16.msra.mxu0 %v1977_v19  ;;  %v2258_v19 = vsel %vm2191_vm4, 0.0, %v2128_v16 }
  0x1f   :  { %1809 = vmatprep.subr.bf16.mxu0 %v2123_v2 }
  0x22   :  { %1810 = vmatpush3.bf16.msra.mxu0 %v1978_v20 }
  0x23   :  { %1829 = vmatprep.subr.bf16.mxu0 %v2123_v2 }
  0x94   :  { %v42_v21 = vpop.permute.xlu0 %41 }
  0x95   :  { %vm46_vm7 = vcmp.eq.s32.totalorder %v2178_v4, %v42_v21 }
  0x96   :  { %v1678_v23 = vsel %vm46_vm7, 1.0, %v2123_v2 }
  0x98   :  { %v45_v22 = vpop.permute.xlu0 %44 }
  0x99   :  { %vm47_vm8 = vcmp.eq.s32.totalorder %v2178_v4, %v45_v22 }
  0x9a   :  { %v1679_v24 = vsel %vm47_vm8, 1.0, %v2123_v2 }
  0x9b   :  { %v52_v25 = vpack.c.bf16 %v1679_v24, %v1678_v23  ;;  %v2262_v23 = vsel %vm2195_vm5, 0.0, %v2128_v16 }
  0x9d   :  { %1812 = vmatmul.mubr.msk.bf16.vlgmr.msra.gmra.mrb[0].mxu0 %vm85_vm9, %v52_v25 }
  0x9e   :  { %1831 = vmatprep.mubr.msk.bf16.mxu0 %vm2124_vm6, %v2123_v2 }
 0x170   :  { %v123_v28 = vpop.f32.mrb[0].mxu0 }
 0x171   :  { %v132_v29 = vadd.f32 %v131_v27, %v123_v28  ;;  %v1813_v30 = vpop.f32.mrb[1].mxu0 }
 0x172   :  { %v126_v31 = vpop.f32.mrb[2].mxu0 }
 0x173   :  { %v133_v32 = vadd.f32 %v131_v27, %v126_v31  ;;  %v1814_v33 = vpop.f32.mrb[3].mxu0  ;;  %v135_v34 = vsel %vm134_vm10, %v132_v29, 0.0 }
 0x174   :  { %136 = vadd.xlane.f32.xlu1 %v135_v34 }
 0x175   :  { %v138_v35 = vsel %vm134_vm10, %v133_v32, 0.0 }
 0x178   :  { %139 = vadd.xlane.f32.xlu1 %v138_v35 }
 0x201   :  { %v137_v36 = vpop.xlane.xlu1 %136 }
 0x202   :  { %v142_v37 = vmul.f32 0.03125, %v137_v36 }
 0x204   :  { %v144_v38 = vsub.f32 %v132_v29, %v142_v37 }
 0x205   :  { %v140_v39 = vpop.xlane.xlu1 %139 }
 0x206   :  { %v143_v40 = vmul.f32 0.03125, %v140_v39  ;;  %v146_v41 = vmul.f32 %v144_v38, %v144_v38 }
 0x208   :  { %v145_v42 = vsub.f32 %v133_v32, %v143_v40  ;;  %v148_v43 = vsel %vm134_vm10, %v146_v41, 0.0 }
 0x209   :  { %149 = vadd.xlane.f32.xlu0 %v148_v43 }
 0x20a   :  { %v147_v44 = vmul.f32 %v145_v42, %v145_v42 }
 0x20c   :  { %v151_v45 = vsel %vm134_vm10, %v147_v44, 0.0 }
 0x20d   :  { %152 = vadd.xlane.f32.xlu1 %v151_v45 }
 0x296   :  { %v150_v48 = vpop.xlane.xlu0 %149 }
 0x297   :  { %v154_v49 = vmul.f32 0.03125, %v150_v48 }
 0x299   :  { %v156_v50 = vadd.f32 1e-05, %v154_v49 }
 0x29a   :  { %v153_v51 = vpop.xlane.xlu1 %152 }
 0x29b   :  { %2003 = vrsqrt.f32 %v156_v50  ;;  %v155_v52 = vmul.f32 0.03125, %v153_v51 }
 0x29d   :  { %v157_v53 = vadd.f32 1e-05, %v155_v52 }
 0x29f   :  { %2005 = vrsqrt.f32 %v157_v53 }
 0x2a5   :  { %v2004_v54 = vpop.eup %2003 }
 0x2a6   :  { %v160_v55 = vmul.f32 %v2004_v54, %v144_v38 }
 0x2a8   :  { %v167_v59 = vmul.f32 %v1685_v56, %v160_v55 }
 0x2a9   :  { %v2006_v57 = vpop.eup %2005 }
 0x2aa   :  { %v161_v58 = vmul.f32 %v2006_v57, %v145_v42  ;;  %v2225_v62 = vadd.f32 %v1686_v60, %v167_v59 }
 0x2ac   :  { %v168_v61 = vmul.f32 %v1685_v56, %v161_v58 }
 0x2ae   :  { %v2227_v63 = vadd.f32 %v1686_v60, %v168_v61 }
 0x2b0   :  { %v196_v0 = vpack.c.bf16 %v2227_v63, %v2225_v62 }
 0x2b2   :  { %1820 = vmatmul.mubr.msk.bf16.vlgmr.msra.gmra.mrb[0].mxu1 %vm134_vm10, %v196_v0 }
 0x2b3   :  { %1825 = vmatprep.mubr.msk.bf16.mxu1 %vm2124_vm6, %v2123_v2 }
 0x385   :  { %v255_v3 = vpop.f32.mrb[0].mxu1 }
 0x386   :  { %v1821_v5 = vpop.f32.mrb[1].mxu1  ;;  %v256_v7 = vadd.f32 %v1687_v1, %v255_v3 }
 0x387   :  { %v258_v6 = vpop.f32.mrb[2].mxu1 }
 0x388   :  { %v259_v8 = vadd.f32 %v1687_v1, %v258_v6  ;;  %v1822_v9 = vpop.f32.mrb[3].mxu1 }
 0x38a   :  { %v2237_v10 = vpack.c.bf16 %v259_v8, %v256_v7 }
 0x38c   :  { %264 = vrot.lane.b32.xlu1 %v2237_v10, %s2125_s16 }
 0x390   :  { %390 = vrot.lane.b32.xlu1 %v2237_v10, %s2126_s17 }
 0x394   :  { %388 = vrot.lane.b32.xlu1 %v2237_v10, %s2127_s18 }
 0x3fe   :  { %v265_v11 = vpop.permute.xlu1 %264 }
 0x3ff   :  { %v271_v12 = vsel %vm266_vm11, %v265_v11, 0 }
 0x400   :  { %1824 = vmatpush3.bf16.xpose.msra.mxu1 %v271_v12 }
 0x401   :  { %1835 = vmatprep.subr.bf16.mxu1 %v2123_v2 }
 0x402   :  { %v391_v13 = vpop.permute.xlu1 %390 }
 0x403   :  { %v396_v14 = vsel %vm266_vm11, %v391_v13, 0 }
 0x406   :  { %v389_v15 = vpop.permute.xlu1 %388 }
 0x407   :  { %1826 = vmatmul.mubr.msk.bf16.vlgmr.msra.gmra.mrb[4].mxu1 %vm266_vm11, %v2237_v10 }
 0x408   :  { %1836 = vmatpush3.bf16.xpose.msra.mxu1 %v396_v14  ;;  %1837 = vmatprep.mubr.msk.bf16.mxu1 %vm2124_vm6, %v2123_v2 }
 0x409   :  { %1847 = vmatprep.subr.bf16.mxu1 %v2123_v2 }
 0x40f   :  { %1838 = vmatmul.mubr.msk.bf16.vlgmr.msra.gmra.mrb[8].mxu1 %vm266_vm11, %v389_v15  ;;  %v1981_v15 = vld [vmem:[#allocation2 + $0x38] sm:$0xff]  }
 0x410   :  { %1851 = vmatprep.mubr.msk.bf16.mxu1 %vm2124_vm6, %v2123_v2  ;;  %1848 = vmatpush3.bf16.msra.mxu1 %v1981_v15  ;;  %v1988_v15 = vld [vmem:[#allocation2 + $0x70] sm:$0xff]  }
 0x411   :  { %1849 = vmatprep.subr.bf16.mxu1 %v2123_v2 }
 0x4da   :  { %v307_v20 = vpop.f32.mrb[4].mxu1 }
 0x4db   :  { %v314_v21 = vmul.f32 0.25, %v307_v20  ;;  %v1827_v22 = vpop.f32.mrb[5].mxu1  ;;  %v1982_v20 = vld [vmem:[#allocation2 + $0x40] sm:$0xff]  }
 0x4dc   :  { %v310_v24 = vpop.f32.mrb[6].mxu1  ;;  %1850 = vmatpush3.bf16.msra.mxu1 %v1982_v20 }
 0x4dd   :  { %v315_v25 = vmul.f32 0.25, %v310_v24  ;;  %v1828_v26 = vpop.f32.mrb[7].mxu1  ;;  %v316_v27 = vadd.f32 %v314_v21, %v2258_v19  ;;  %1863 = vmatprep.subr.bf16.mxu1 %v2123_v2 }
 0x4df   :  { %v318_v28 = vsel %vm266_vm11, %v316_v27, -inf  ;;  %v317_v29 = vadd.f32 %v315_v25, %v2262_v23 }
 0x4e0   :  { %319 = vmax.xlane.f32.xlu1 %v318_v28 }
 0x4e1   :  { %v321_v17 = vsel %vm266_vm11, %v317_v29, -inf }
 0x4e2   :  { %322 = vmax.xlane.f32.xlu0 %v321_v17  ;;  %v432_v30 = vpop.f32.mrb[8].mxu1 }
 0x4e3   :  { %v439_v31 = vmul.f32 0.25, %v432_v30  ;;  %v1839_v32 = vpop.f32.mrb[9].mxu1 }
 0x4e4   :  { %v435_v33 = vpop.f32.mrb[10].mxu1 }
 0x4e5   :  { %v440_v18 = vmul.f32 0.25, %v435_v33  ;;  %v1840_v34 = vpop.f32.mrb[11].mxu1  ;;  %v441_v35 = vadd.f32 %v439_v31, %v2258_v19 }
 0x4e6   :  { %v1695_v34 = vld [vmem:[%s2483_s4 + $0x3] ss:$0 sm:$0xff] }
 0x4e7   :  { %v443_v36 = vsel %vm266_vm11, %v441_v35, -inf  ;;  %v442_v37 = vadd.f32 %v440_v18, %v2262_v23 }
 0x4e8   :  { %444 = vmax.xlane.f32.xlu0 %v443_v36 }
 0x4e9   :  { %v446_v38 = vsel %vm266_vm11, %v442_v37, -inf }
 0x4ec   :  { %447 = vmax.xlane.f32.xlu0 %v446_v38 }
 0x4f1   :  { %466 = vrot.lane.b32.xlu1 %v2237_v10, %s2129_s19 }
 0x56d   :  { %v320_v39 = vpop.xlane.xlu1 %319 }
 0x56e   :  { %v324_v40 = vsub.f32 %v316_v27, %v320_v39 }
 0x56f   :  { %v323_v41 = vpop.xlane.xlu0 %322 }
 0x570   :  { %v326_v42 = vmul.f32 1.442695, %v324_v40  ;;  %v325_v43 = vsub.f32 %v317_v29, %v323_v41 }
 0x571   :  { %v467_v9 = vpop.permute.xlu1 %466 }
 0x572   :  { %2007 = vpow2.f32 %v326_v42  ;;  %v328_v44 = vmul.f32 1.442695, %v325_v43 }
 0x574   :  { %2009 = vpow2.f32 %v328_v44 }
 0x575   :  { %v445_v45 = vpop.xlane.xlu0 %444 }
 0x576   :  { %v449_v46 = vsub.f32 %v441_v35, %v445_v45 }
 0x578   :  { %v451_v47 = vmul.f32 1.442695, %v449_v46 }
 0x579   :  { %v448_v48 = vpop.xlane.xlu0 %447 }
 0x57a   :  { %2011 = vpow2.f32 %v451_v47  ;;  %v450_v49 = vsub.f32 %v442_v37, %v448_v48 }
 0x57c   :  { %v2008_v50 = vpop.eup %2007  ;;  %v453_v51 = vmul.f32 1.442695, %v450_v49 }
 0x57d   :  { %v330_v52 = vsel %vm266_vm11, %v2008_v50, 0.0 }
 0x57e   :  { %v2010_v53 = vpop.eup %2009  ;;  %2013 = vpow2.f32 %v453_v51  ;;  %331 = vadd.xlane.f32.xlu0 %v330_v52 }
 0x57f   :  { %v333_v54 = vsel %vm266_vm11, %v2010_v53, 0.0 }
 0x582   :  { %334 = vadd.xlane.f32.xlu0 %v333_v54  ;;  %v1983_v54 = vld [vmem:[#allocation2 + $0x48] sm:$0xff]  }
 0x584   :  { %v2012_v55 = vpop.eup %2011 }
 0x585   :  { %v455_v56 = vsel %vm266_vm11, %v2012_v55, 0.0 }
 0x586   :  { %456 = vadd.xlane.f32.xlu0 %v455_v56 }
 0x588   :  { %v2014_v57 = vpop.eup %2013 }
 0x589   :  { %v458_v58 = vsel %vm266_vm11, %v2014_v57, 0.0 }
 0x58a   :  { %459 = vadd.xlane.f32.xlu0 %v458_v58 }
 0x5a0   :  { %341 = vrot.lane.b32.xlu0 %v2237_v10, %s2120_s28 }
 0x60b   :  { %v332_v59 = vpop.xlane.xlu0 %331 }
 0x60c   :  { %2015 = vrcp.f32 %v332_v59 }
 0x60f   :  { %v335_v60 = vpop.xlane.xlu0 %334 }
 0x610   :  { %2017 = vrcp.f32 %v335_v60 }
 0x613   :  { %v457_v61 = vpop.xlane.xlu0 %456 }
 0x614   :  { %2019 = vrcp.f32 %v457_v61 }
 0x616   :  { %v2016_v1 = vpop.eup %2015 }
 0x617   :  { %v460_v0 = vpop.xlane.xlu0 %459  ;;  %v338_v5 = vmul.f32 %v2016_v1, %v2008_v50 }
 0x618   :  { %2021 = vrcp.f32 %v460_v0  ;;  %v1699_v0 = vld [vmem:[%s2483_s4 + $0x4] ss:$0 sm:$0xff] }
 0x61a   :  { %v2018_v3 = vpop.eup %2017 }
 0x61b   :  { %v339_v6 = vmul.f32 %v2018_v3, %v2010_v53  ;;  %v342_v7 = vpop.permute.xlu0 %341 }
 0x61c   :  { %1830 = vmatpush3.bf16.msra.mxu0 %v342_v7  ;;  %v1700_v7 = vld [vmem:[%s2483_s4 + $0x5] ss:$0 sm:$0xff] }
 0x61d   :  { %v340_v8 = vpack.c.bf16 %v339_v6, %v338_v5  ;;  %1841 = vmatprep.subr.bf16.mxu0 %v2123_v2 }
 0x61e   :  { %v2020_v10 = vpop.eup %2019 }
 0x61f   :  { %1832 = vmatmul.mubr.msk.bf16.vlgmr.msra.gmra.mrb[4].mxu0 %vm266_vm11, %v340_v8  ;;  %v463_v12 = vmul.f32 %v2020_v10, %v2012_v55 }
 0x620   :  { %1842 = vmatpush3.bf16.msra.mxu0 %v467_v9  ;;  %1843 = vmatprep.mubr.msk.bf16.mxu0 %vm2124_vm6, %v2123_v2 }
 0x621   :  { %1855 = vmatprep.subr.bf16.mxu0 %v2123_v2 }
 0x622   :  { %v2022_v11 = vpop.eup %2021 }
 0x623   :  { %v464_v13 = vmul.f32 %v2022_v11, %v2014_v57 }
 0x625   :  { %v465_v14 = vpack.c.bf16 %v464_v13, %v463_v12  ;;  %v1985_v12 = vld [vmem:[#allocation2 + $0x58] sm:$0xff]   ;;  %v1986_v13 = vld [vmem:[#allocation2 + $0x60] sm:$0xff]  }
 0x627   :  { %1844 = vmatmul.mubr.msk.bf16.vlgmr.msra.gmra.mrb[8].mxu0 %vm266_vm11, %v465_v14  ;;  %v1987_v14 = vld [vmem:[#allocation2 + $0x68] sm:$0xff]  }
 0x628   :  { %1859 = vmatprep.mubr.msk.bf16.mxu0 %vm2124_vm6, %v2123_v2  ;;  %1856 = vmatpush3.bf16.msra.mxu0 %v1983_v54 }
 0x629   :  { %1857 = vmatprep.subr.bf16.mxu0 %v2123_v2 }
 0x6f2   :  { %v381_v16 = vpop.f32.mrb[4].mxu0 }
 0x6f3   :  { %v1833_v21 = vpop.f32.mrb[5].mxu0 }
 0x6f4   :  { %v384_v22 = vpop.f32.mrb[6].mxu0 }
 0x6f5   :  { %v1834_v24 = vpop.f32.mrb[7].mxu0 }
 0x6fa   :  { %v506_v25 = vpop.f32.mrb[8].mxu0 }
 0x6fb   :  { %v1845_v26 = vpop.f32.mrb[9].mxu0 }
 0x6fc   :  { %v509_v27 = vpop.f32.mrb[10].mxu0 }
 0x6fd   :  { %v1965_v28 = vpack.i.bf16 %v509_v27, %v506_v25  ;;  %v1846_v29 = vpop.f32.mrb[11].mxu0 }
 0x6ff   :  { %1966 = vrot.lane.b32.xlu0 %v1965_v28, %s2130_s20 }
 0x771   :  { %v1967_v17 = vpop.permute.xlu0 %1966 }
 0x772   :  { %v1969_v30 = vunpack.i.h.bf16 %v1967_v17  ;;  %v1968_v31 = vunpack.i.l.bf16 %v1967_v17 }
 0x774   :  { %v522_v32 = vsel %vm266_vm11, %v384_v22, %v1969_v30  ;;  %v521_v33 = vsel %vm266_vm11, %v381_v16, %v1968_v31  ;;  %v1701_v16 = vld [vmem:[%s2483_s4 + $0x6] ss:$0 sm:$0xff] }
 0x775   :  { %v523_v18 = vpack.c.bf16 %v522_v32, %v521_v33 }
 0x777   :  { %1852 = vmatmul.mubr.msk.bf16.vlgmr.msra.gmra.mrb[12].mxu1 %vm134_vm10, %v523_v18 }
 0x778   :  { %1871 = vmatprep.mubr.msk.bf16.mxu1 %vm2124_vm6, %v2123_v2  ;;  %1864 = vmatpush3.bf16.msra.mxu1 %v1985_v12  ;;  %v1711_v12 = vld [vmem:[%s2483_s4 + $0x8] ss:$0 sm:$0xff] }
 0x779   :  { %1865 = vmatprep.subr.bf16.mxu1 %v2123_v2 }
 0x77c   :  { %1866 = vmatpush3.bf16.msra.mxu1 %v1986_v13 }
 0x77d   :  { %1867 = vmatprep.subr.bf16.mxu1 %v2123_v2 }
 0x780   :  { %1868 = vmatpush3.bf16.msra.mxu1 %v1987_v14 }
 0x781   :  { %1869 = vmatprep.subr.bf16.mxu1 %v2123_v2 }
 0x784   :  { %1870 = vmatpush3.bf16.msra.mxu1 %v1988_v15 }
 0x785   :  { %1889 = vmatprep.subr.bf16.mxu1 %v2123_v2 }
 0x84a   :  { %v582_v35 = vpop.f32.mrb[12].mxu1 }
 0x84b   :  { %v583_v36 = vadd.f32 %v1695_v34, %v582_v35  ;;  %v1853_v37 = vpop.f32.mrb[13].mxu1 }
 0x84c   :  { %v585_v38 = vpop.f32.mrb[14].mxu1 }
 0x84d   :  { %v586_v39 = vadd.f32 %v1695_v34, %v585_v38  ;;  %v1854_v40 = vpop.f32.mrb[15].mxu1  ;;  %v589_v41 = vadd.f32 %v583_v36, %v2225_v62 }
 0x84f   :  { %v591_v42 = vsel %vm134_vm10, %v589_v41, 0.0  ;;  %v590_v43 = vadd.f32 %v586_v39, %v2227_v63  ;;  %v1984_v63 = vld [vmem:[#allocation2 + $0x50] sm:$0xff]  }
 0x850   :  { %592 = vadd.xlane.f32.xlu1 %v591_v42  ;;  %1858 = vmatpush3.bf16.msra.mxu0 %v1984_v63 }
 0x851   :  { %v594_v44 = vsel %vm134_vm10, %v590_v43, 0.0  ;;  %1875 = vmatprep.subr.bf16.mxu0 %v2123_v2 }
 0x852   :  { %595 = vadd.xlane.f32.xlu0 %v594_v44  ;;  %v1705_v44 = vld [vmem:[%s2483_s4 + $0x7] ss:$0 sm:$0xff] }
 0x8dd   :  { %v593_v45 = vpop.xlane.xlu1 %592 }
 0x8de   :  { %v597_v46 = vmul.f32 0.03125, %v593_v45 }
 0x8df   :  { %v596_v47 = vpop.xlane.xlu0 %595 }
 0x8e0   :  { %v599_v48 = vsub.f32 %v589_v41, %v597_v46  ;;  %v598_v49 = vmul.f32 0.03125, %v596_v47 }
 0x8e2   :  { %v600_v50 = vsub.f32 %v590_v43, %v598_v49  ;;  %v601_v51 = vmul.f32 %v599_v48, %v599_v48 }
 0x8e4   :  { %v603_v52 = vsel %vm134_vm10, %v601_v51, 0.0  ;;  %v602_v53 = vmul.f32 %v600_v50, %v600_v50 }
 0x8e5   :  { %604 = vadd.xlane.f32.xlu0 %v603_v52 }
 0x8e6   :  { %v606_v62 = vsel %vm134_vm10, %v602_v53, 0.0 }
 0x8e7   :  { %607 = vadd.xlane.f32.xlu1 %v606_v62 }
 0x972   :  { %v605_v55 = vpop.xlane.xlu0 %604 }
 0x973   :  { %v609_v56 = vmul.f32 0.03125, %v605_v55 }
 0x974   :  { %v608_v57 = vpop.xlane.xlu1 %607 }
 0x975   :  { %v611_v58 = vadd.f32 1e-05, %v609_v56  ;;  %v610_v59 = vmul.f32 0.03125, %v608_v57 }
 0x977   :  { %2023 = vrsqrt.f32 %v611_v58  ;;  %v612_v60 = vadd.f32 1e-05, %v610_v59 }
 0x979   :  { %2025 = vrsqrt.f32 %v612_v60 }
 0x981   :  { %v2024_v61 = vpop.eup %2023 }
 0x982   :  { %v615_v1 = vmul.f32 %v2024_v61, %v599_v48 }
 0x983   :  { %v2026_v3 = vpop.eup %2025 }
 0x984   :  { %v622_v5 = vmul.f32 %v1699_v0, %v615_v1  ;;  %v616_v6 = vmul.f32 %v2026_v3, %v600_v50  ;;  %v1989_v1 = vld [vmem:[#allocation2 + $0x78] sm:$0xff]   ;;  %v1990_v3 = vld [vmem:[#allocation2 + $0x80] sm:$0xff]  }
 0x986   :  { %v623_v8 = vmul.f32 %v1699_v0, %v616_v6  ;;  %v629_v9 = vadd.f32 %v1700_v7, %v622_v5 }
 0x988   :  { %v630_v10 = vadd.f32 %v1700_v7, %v623_v8 }
 0x98a   :  { %v631_v11 = vpack.c.bf16 %v630_v10, %v629_v9 }
 0x98c   :  { %1860 = vmatmul.mubr.msk.bf16.vlgmr.msra.gmra.mrb[12].mxu0 %vm134_vm10, %v631_v11 }
 0x98d   :  { %1879 = vmatprep.mubr.msk.bf16.mxu0 %vm2124_vm6, %v2123_v2  ;;  %1876 = vmatpush3.bf16.msra.mxu0 %v1989_v1 }
 0x98e   :  { %1877 = vmatprep.subr.bf16.mxu0 %v2123_v2 }
 0x991   :  { %1878 = vmatpush3.bf16.msra.mxu0 %v1990_v3 }
 0x992   :  { %1883 = vmatprep.subr.bf16.mxu0 %v2123_v2 }
 0xa5f   :  { %v690_v20 = vpop.f32.mrb[12].mxu0 }
 0xa60   :  { %v691_v21 = vadd.f32 %v1701_v16, %v690_v20  ;;  %v1861_v22 = vpop.f32.mrb[13].mxu0  ;;  %v1712_v20 = vld [vmem:[%s2483_s4 + $0x9] ss:$0 sm:$0xff] }
 0xa61   :  { %v693_v24 = vpop.f32.mrb[14].mxu0 }
 0xa62   :  { %v699_v25 = vmul.f32 0.044715, %v691_v21  ;;  %v694_v26 = vadd.f32 %v1701_v16, %v693_v24  ;;  %v1862_v27 = vpop.f32.mrb[15].mxu0  ;;  %v697_v38 = vmul.f32 0.5, %v691_v21 }
 0xa64   :  { %v701_v28 = vmul.f32 %v699_v25, %v691_v21  ;;  %v700_v29 = vmul.f32 0.044715, %v694_v26  ;;  %v698_v39 = vmul.f32 0.5, %v694_v26 }
 0xa66   :  { %v703_v17 = vmul.f32 %v701_v28, %v691_v21  ;;  %v702_v30 = vmul.f32 %v700_v29, %v694_v26 }
 0xa68   :  { %v705_v31 = vadd.f32 %v703_v17, %v691_v21  ;;  %v704_v32 = vmul.f32 %v702_v30, %v694_v26 }
 0xa6a   :  { %v707_v33 = vmul.f32 0.7978846, %v705_v31  ;;  %v706_v18 = vadd.f32 %v704_v32, %v694_v26  ;;  %v1713_v26 = vld [vmem:[%s2483_s4 + $0xa] ss:$0 sm:$0xff] }
 0xa6c   :  { %2027 = vtanh.f32 %v707_v33  ;;  %v708_v34 = vmul.f32 0.7978846, %v706_v18 }
 0xa6e   :  { %2029 = vtanh.f32 %v708_v34 }
 0xa76   :  { %v2028_v35 = vpop.eup %2027 }
 0xa77   :  { %v711_v36 = vadd.f32 1.0, %v2028_v35 }
 0xa78   :  { %v2030_v37 = vpop.eup %2029 }
 0xa79   :  { %v712_v40 = vadd.f32 1.0, %v2030_v37  ;;  %v713_v41 = vmul.f32 %v711_v36, %v697_v38 }
 0xa7b   :  { %v714_v42 = vmul.f32 %v712_v40, %v698_v39 }
 0xa7d   :  { %v715_v43 = vpack.c.bf16 %v714_v42, %v713_v41 }
 0xa7f   :  { %1872 = vmatmul.mubr.msk.bf16.vlgmr.msra.gmra.mrb[16].mxu1 %vm85_vm9, %v715_v43 }
 0xa80   :  { %1891 = vmatprep.mubr.msk.bf16.mxu1 %vm2124_vm6, %v2123_v2 }
 0xb52   :  { %v790_v45 = vpop.f32.mrb[16].mxu1 }
 0xb53   :  { %v791_v46 = vadd.f32 %v1705_v44, %v790_v45  ;;  %v1873_v47 = vpop.f32.mrb[17].mxu1 }
 0xb54   :  { %v793_v48 = vpop.f32.mrb[18].mxu1 }
 0xb55   :  { %v794_v49 = vadd.f32 %v1705_v44, %v793_v48  ;;  %v1874_v50 = vpop.f32.mrb[19].mxu1  ;;  %v797_v51 = vadd.f32 %v791_v46, %v629_v9 }
 0xb57   :  { %v799_v52 = vsel %vm134_vm10, %v797_v51, 0.0  ;;  %v798_v53 = vadd.f32 %v794_v49, %v630_v10 }
 0xb58   :  { %800 = vadd.xlane.f32.xlu0 %v799_v52 }
 0xb59   :  { %v802_v62 = vsel %vm134_vm10, %v798_v53, 0.0 }
 0xb5a   :  { %803 = vadd.xlane.f32.xlu1 %v802_v62 }
 0xbe5   :  { %v801_v54 = vpop.xlane.xlu0 %800 }
 0xbe6   :  { %v805_v63 = vmul.f32 0.03125, %v801_v54 }
 0xbe7   :  { %v804_v55 = vpop.xlane.xlu1 %803 }
 0xbe8   :  { %v807_v56 = vsub.f32 %v797_v51, %v805_v63  ;;  %v806_v57 = vmul.f32 0.03125, %v804_v55 }
 0xbea   :  { %v808_v58 = vsub.f32 %v798_v53, %v806_v57  ;;  %v809_v59 = vmul.f32 %v807_v56, %v807_v56 }
 0xbec   :  { %v811_v60 = vsel %vm134_vm10, %v809_v59, 0.0  ;;  %v810_v61 = vmul.f32 %v808_v58, %v808_v58 }
 0xbed   :  { %812 = vadd.xlane.f32.xlu0 %v811_v60 }
 0xbee   :  { %v814_v0 = vsel %vm134_vm10, %v810_v61, 0.0 }
 0xbef   :  { %815 = vadd.xlane.f32.xlu1 %v814_v0 }
 0xc7a   :  { %v813_v5 = vpop.xlane.xlu0 %812 }
 0xc7b   :  { %v817_v6 = vmul.f32 0.03125, %v813_v5 }
 0xc7c   :  { %v816_v7 = vpop.xlane.xlu1 %815 }
 0xc7d   :  { %v819_v8 = vadd.f32 1e-05, %v817_v6  ;;  %v818_v9 = vmul.f32 0.03125, %v816_v7 }
 0xc7f   :  { %2031 = vrsqrt.f32 %v819_v8  ;;  %v820_v10 = vadd.f32 1e-05, %v818_v9 }
 0xc81   :  { %2033 = vrsqrt.f32 %v820_v10 }
 0xc89   :  { %v2032_v11 = vpop.eup %2031 }
 0xc8a   :  { %v823_v13 = vmul.f32 %v2032_v11, %v807_v56 }
 0xc8b   :  { %v2034_v14 = vpop.eup %2033 }
 0xc8c   :  { %v830_v15 = vmul.f32 %v1711_v12, %v823_v13  ;;  %v824_v16 = vmul.f32 %v2034_v14, %v808_v58 }
 0xc8e   :  { %v831_v21 = vmul.f32 %v1711_v12, %v824_v16  ;;  %v2341_v22 = vadd.f32 %v1712_v20, %v830_v15 }
 0xc90   :  { %v2343_v24 = vadd.f32 %v1712_v20, %v831_v21 }
 0xc92   :  { %v839_v25 = vpack.c.bf16 %v2343_v24, %v2341_v22 }
 0xc94   :  { %1880 = vmatmul.mubr.msk.bf16.vlgmr.msra.gmra.mrb[16].mxu0 %vm134_vm10, %v839_v25 }
 0xc95   :  { %1885 = vmatprep.mubr.msk.bf16.mxu0 %vm2124_vm6, %v2123_v2 }
 0xd67   :  { %v898_v27 = vpop.f32.mrb[16].mxu0 }
 0xd68   :  { %v1881_v28 = vpop.f32.mrb[17].mxu0  ;;  %v899_v17 = vadd.f32 %v1713_v26, %v898_v27 }
 0xd69   :  { %v901_v29 = vpop.f32.mrb[18].mxu0 }
 0xd6a   :  { %v902_v30 = vadd.f32 %v1713_v26, %v901_v29  ;;  %v1882_v31 = vpop.f32.mrb[19].mxu0 }
 0xd6c   :  { %v2353_v32 = vpack.c.bf16 %v902_v30, %v899_v17 }
 0xd6e   :  { %1032 = vrot.lane.b32.xlu1 %v2353_v32, %s2126_s17  ;;  %907 = vrot.lane.b32.xlu0 %v2353_v32, %s2125_s16 }
 0xd72   :  { %1030 = vrot.lane.b32.xlu1 %v2353_v32, %s2127_s18 }
 0xde0   :  { %v908_v33 = vpop.permute.xlu0 %907  ;;  %v1033_v34 = vpop.permute.xlu1 %1032 }
 0xde1   :  { %v913_v18 = vsel %vm266_vm11, %v908_v33, 0  ;;  %v1038_v35 = vsel %vm266_vm11, %v1033_v34, 0 }
 0xde2   :  { %1884 = vmatpush3.bf16.xpose.msra.mxu0 %v913_v18  ;;  %v1991_v18 = vld [vmem:[#allocation2 + $0x88] sm:$0xff]  }
 0xde3   :  { %1895 = vmatprep.subr.bf16.mxu0 %v2123_v2 }
 0xde4   :  { %v1031_v36 = vpop.permute.xlu1 %1030 }
 0xde9   :  { %1886 = vmatmul.mubr.msk.bf16.vlgmr.msra.gmra.mrb[20].mxu0 %vm266_vm11, %v2353_v32 }
 0xdea   :  { %1896 = vmatpush3.bf16.xpose.msra.mxu0 %v1038_v35  ;;  %1897 = vmatprep.mubr.msk.bf16.mxu0 %vm2124_vm6, %v2123_v2 }
 0xdeb   :  { %1907 = vmatprep.subr.bf16.mxu0 %v2123_v2 }
 0xdf1   :  { %1898 = vmatmul.mubr.msk.bf16.vlgmr.msra.gmra.mrb[24].mxu0 %vm266_vm11, %v1031_v36 }
 0xdf2   :  { %1911 = vmatprep.mubr.msk.bf16.mxu0 %vm2124_vm6, %v2123_v2  ;;  %1908 = vmatpush3.bf16.msra.mxu0 %v1991_v18 }
 0xdf3   :  { %1909 = vmatprep.subr.bf16.mxu0 %v2123_v2 }
 0xebc   :  { %v949_v37 = vpop.f32.mrb[20].mxu0 }
 0xebd   :  { %v956_v38 = vmul.f32 0.25, %v949_v37  ;;  %v1887_v39 = vpop.f32.mrb[21].mxu0 }
 0xebe   :  { %v952_v40 = vpop.f32.mrb[22].mxu0 }
 0xebf   :  { %v957_v41 = vmul.f32 0.25, %v952_v40  ;;  %v1888_v42 = vpop.f32.mrb[23].mxu0  ;;  %v958_v43 = vadd.f32 %v956_v38, %v2258_v19  ;;  %v1992_v38 = vld [vmem:[#allocation2 + $0x90] sm:$0xff]  }
 0xec0   :  { %1910 = vmatpush3.bf16.msra.mxu0 %v1992_v38 }
 0xec1   :  { %v960_v44 = vsel %vm266_vm11, %v958_v43, -inf  ;;  %v959_v45 = vadd.f32 %v957_v41, %v2262_v23  ;;  %1923 = vmatprep.subr.bf16.mxu0 %v2123_v2 }
 0xec2   :  { %961 = vmax.xlane.f32.xlu0 %v960_v44 }
 0xec3   :  { %v963_v46 = vsel %vm266_vm11, %v959_v45, -inf }
 0xec4   :  { %964 = vmax.xlane.f32.xlu1 %v963_v46  ;;  %v1074_v47 = vpop.f32.mrb[24].mxu0 }
 0xec5   :  { %v1081_v48 = vmul.f32 0.25, %v1074_v47  ;;  %v1899_v49 = vpop.f32.mrb[25].mxu0 }
 0xec6   :  { %v1077_v50 = vpop.f32.mrb[26].mxu0 }
 0xec7   :  { %v1082_v51 = vmul.f32 0.25, %v1077_v50  ;;  %v1900_v52 = vpop.f32.mrb[27].mxu0  ;;  %v1083_v53 = vadd.f32 %v1081_v48, %v2258_v19  ;;  %v1721_v50 = vld [vmem:[%s2483_s4 + $0xb] ss:$0 sm:$0xff] }
 0xec9   :  { %v1085_v62 = vsel %vm266_vm11, %v1083_v53, -inf  ;;  %v1084_v54 = vadd.f32 %v1082_v51, %v2262_v23 }
 0xeca   :  { %1086 = vmax.xlane.f32.xlu0 %v1085_v62 }
 0xecb   :  { %v1088_v63 = vsel %vm266_vm11, %v1084_v54, -inf }
 0xece   :  { %1089 = vmax.xlane.f32.xlu0 %v1088_v63 }
 0xf4f   :  { %v962_v55 = vpop.xlane.xlu0 %961 }
 0xf50   :  { %v966_v56 = vsub.f32 %v958_v43, %v962_v55 }
 0xf51   :  { %v965_v57 = vpop.xlane.xlu1 %964 }
 0xf52   :  { %v968_v58 = vmul.f32 1.442695, %v966_v56  ;;  %v967_v59 = vsub.f32 %v959_v45, %v965_v57 }
 0xf54   :  { %2035 = vpow2.f32 %v968_v58  ;;  %v970_v60 = vmul.f32 1.442695, %v967_v59 }
 0xf56   :  { %2037 = vpow2.f32 %v970_v60 }
 0xf57   :  { %v1087_v61 = vpop.xlane.xlu0 %1086 }
 0xf58   :  { %v1091_v0 = vsub.f32 %v1083_v53, %v1087_v61 }
 0xf5a   :  { %v1093_v1 = vmul.f32 1.442695, %v1091_v0 }
 0xf5b   :  { %v1090_v19 = vpop.xlane.xlu0 %1089 }
 0xf5c   :  { %2039 = vpow2.f32 %v1093_v1  ;;  %v1092_v3 = vsub.f32 %v1084_v54, %v1090_v19 }
 0xf5e   :  { %v2036_v5 = vpop.eup %2035  ;;  %v1095_v23 = vmul.f32 1.442695, %v1092_v3 }
 0xf5f   :  { %v972_v6 = vsel %vm266_vm11, %v2036_v5, 0.0 }
 0xf60   :  { %v2038_v7 = vpop.eup %2037  ;;  %2041 = vpow2.f32 %v1095_v23  ;;  %973 = vadd.xlane.f32.xlu1 %v972_v6  ;;  %v1993_v6 = vld [vmem:[#allocation2 + $0x98] sm:$0xff]  }
 0xf61   :  { %v975_v8 = vsel %vm266_vm11, %v2038_v7, 0.0 }
 0xf62   :  { %976 = vadd.xlane.f32.xlu0 %v975_v8 }
 0xf66   :  { %v2040_v9 = vpop.eup %2039 }
 0xf67   :  { %v1097_v10 = vsel %vm266_vm11, %v2040_v9, 0.0 }
 0xf68   :  { %1098 = vadd.xlane.f32.xlu1 %v1097_v10 }
 0xf6a   :  { %v2042_v11 = vpop.eup %2041 }
 0xf6b   :  { %v1100_v12 = vsel %vm266_vm11, %v2042_v11, 0.0 }
 0xf6c   :  { %1101 = vadd.xlane.f32.xlu0 %v1100_v12 }
 0xf79   :  { %983 = vrot.lane.b32.xlu1 %v2353_v32, %s2120_s28 }
 0xf82   :  { %1108 = vrot.lane.b32.xlu0 %v2353_v32, %s2129_s19 }
 0xfed   :  { %v974_v13 = vpop.xlane.xlu1 %973 }
 0xfee   :  { %2043 = vrcp.f32 %v974_v13 }
 0xfef   :  { %v977_v14 = vpop.xlane.xlu0 %976 }
 0xff0   :  { %2045 = vrcp.f32 %v977_v14  ;;  %v1725_v14 = vld [vmem:[%s2483_s4 + $0xc] ss:$0 sm:$0xff] }
 0xff5   :  { %v1099_v15 = vpop.xlane.xlu1 %1098 }
 0xff6   :  { %2047 = vrcp.f32 %v1099_v15 }
 0xff8   :  { %v2044_v16 = vpop.eup %2043 }
 0xff9   :  { %v984_v20 = vpop.permute.xlu1 %983  ;;  %v1102_v21 = vpop.xlane.xlu0 %1101  ;;  %v980_v26 = vmul.f32 %v2044_v16, %v2036_v5 }
 0xffa   :  { %v2046_v25 = vpop.eup %2045  ;;  %2049 = vrcp.f32 %v1102_v21  ;;  %1890 = vmatpush3.bf16.msra.mxu1 %v984_v20 }
 0xffb   :  { %v981_v27 = vmul.f32 %v2046_v25, %v2038_v7  ;;  %1901 = vmatprep.subr.bf16.mxu1 %v2123_v2  ;;  %v1726_v25 = vld [vmem:[%s2483_s4 + $0xd] ss:$0 sm:$0xff] }
 0xffd   :  { %v1109_v28 = vpop.permute.xlu0 %1108  ;;  %v982_v29 = vpack.c.bf16 %v981_v27, %v980_v26 }
 0xfff   :  { %1892 = vmatmul.mubr.msk.bf16.vlgmr.msra.gmra.mrb[20].mxu1 %vm266_vm11, %v982_v29 }
0x1000   :  { %1902 = vmatpush3.bf16.msra.mxu1 %v1109_v28  ;;  %1903 = vmatprep.mubr.msk.bf16.mxu1 %vm2124_vm6, %v2123_v2  ;;  %v2048_v17 = vpop.eup %2047 }
0x1001   :  { %1915 = vmatprep.subr.bf16.mxu1 %v2123_v2  ;;  %v1105_v31 = vmul.f32 %v2048_v17, %v2040_v9  ;;  %v1995_v17 = vld [vmem:[#allocation2 + $0xa8] sm:$0xff]  }
0x1004   :  { %v2050_v30 = vpop.eup %2049 }
0x1005   :  { %v1106_v32 = vmul.f32 %v2050_v30, %v2042_v11  ;;  %v1996_v30 = vld [vmem:[#allocation2 + $0xb0] sm:$0xff]  }
0x1007   :  { %v1107_v33 = vpack.c.bf16 %v1106_v32, %v1105_v31  ;;  %v1997_v31 = vld [vmem:[#allocation2 + $0xb8] sm:$0xff]   ;;  %v1998_v32 = vld [vmem:[#allocation2 + $0xc0] sm:$0xff]  }
0x1009   :  { %1904 = vmatmul.mubr.msk.bf16.vlgmr.msra.gmra.mrb[24].mxu1 %vm266_vm11, %v1107_v33  ;;  %v1727_v33 = vld [vmem:[%s2483_s4 + $0xe] ss:$0 sm:$0xff] }
0x100a   :  { %1919 = vmatprep.mubr.msk.bf16.mxu1 %vm2124_vm6, %v2123_v2  ;;  %1916 = vmatpush3.bf16.msra.mxu1 %v1993_v6 }
0x100b   :  { %1917 = vmatprep.subr.bf16.mxu1 %v2123_v2 }
0x10d2   :  { %v1023_v34 = vpop.f32.mrb[20].mxu1 }
0x10d3   :  { %v1893_v35 = vpop.f32.mrb[21].mxu1 }
0x10d4   :  { %v1026_v36 = vpop.f32.mrb[22].mxu1 }
0x10d5   :  { %v1894_v37 = vpop.f32.mrb[23].mxu1 }
0x10dc   :  { %v1148_v39 = vpop.f32.mrb[24].mxu1 }
0x10dd   :  { %v1905_v40 = vpop.f32.mrb[25].mxu1 }
0x10de   :  { %v1151_v41 = vpop.f32.mrb[26].mxu1 }
0x10df   :  { %v1970_v42 = vpack.i.bf16 %v1151_v41, %v1148_v39  ;;  %v1906_v43 = vpop.f32.mrb[27].mxu1 }
0x10e1   :  { %1971 = vrot.lane.b32.xlu1 %v1970_v42, %s2130_s20 }
0x1153   :  { %v1972_v44 = vpop.permute.xlu1 %1971 }
0x1154   :  { %v1974_v45 = vunpack.i.h.bf16 %v1972_v44  ;;  %v1973_v46 = vunpack.i.l.bf16 %v1972_v44 }
0x1156   :  { %v1164_v47 = vsel %vm266_vm11, %v1026_v36, %v1974_v45  ;;  %v1163_v48 = vsel %vm266_vm11, %v1023_v34, %v1973_v46 }
0x1157   :  { %v1165_v49 = vpack.c.bf16 %v1164_v47, %v1163_v48 }
0x1159   :  { %1912 = vmatmul.mubr.msk.bf16.vlgmr.msra.gmra.mrb[28].mxu0 %vm134_vm10, %v1165_v49 }
0x115a   :  { %1931 = vmatprep.mubr.msk.bf16.mxu0 %vm2124_vm6, %v2123_v2  ;;  %1924 = vmatpush3.bf16.msra.mxu0 %v1995_v17 }
0x115b   :  { %1925 = vmatprep.subr.bf16.mxu0 %v2123_v2 }
0x115e   :  { %1926 = vmatpush3.bf16.msra.mxu0 %v1996_v30  ;;  %v1738_v30 = vld [vmem:[%s2483_s4 + $0x11] ss:$0 sm:$0xff] }
0x115f   :  { %1927 = vmatprep.subr.bf16.mxu0 %v2123_v2 }
0x1162   :  { %1928 = vmatpush3.bf16.msra.mxu0 %v1997_v31 }
0x1163   :  { %1929 = vmatprep.subr.bf16.mxu0 %v2123_v2 }
0x1166   :  { %1930 = vmatpush3.bf16.msra.mxu0 %v1998_v32 }
0x122c   :  { %v1224_v51 = vpop.f32.mrb[28].mxu0 }
0x122d   :  { %v1225_v52 = vadd.f32 %v1721_v50, %v1224_v51  ;;  %v1913_v53 = vpop.f32.mrb[29].mxu0 }
0x122e   :  { %v1227_v62 = vpop.f32.mrb[30].mxu0 }
0x122f   :  { %v1228_v54 = vadd.f32 %v1721_v50, %v1227_v62  ;;  %v1914_v63 = vpop.f32.mrb[31].mxu0  ;;  %v1231_v55 = vadd.f32 %v1225_v52, %v2341_v22 }
0x1231   :  { %v1233_v56 = vsel %vm134_vm10, %v1231_v55, 0.0  ;;  %v1232_v57 = vadd.f32 %v1228_v54, %v2343_v24  ;;  %v1994_v24 = vld [vmem:[#allocation2 + $0xa0] sm:$0xff]  }
0x1232   :  { %1234 = vadd.xlane.f32.xlu1 %v1233_v56  ;;  %1918 = vmatpush3.bf16.msra.mxu1 %v1994_v24  ;;  %v1731_v56 = vld [vmem:[%s2483_s4 + $0xf] ss:$0 sm:$0xff] }
0x1233   :  { %v1236_v58 = vsel %vm134_vm10, %v1232_v57, 0.0  ;;  %1935 = vmatprep.subr.bf16.mxu1 %v2123_v2 }
0x1234   :  { %1237 = vadd.xlane.f32.xlu0 %v1236_v58 }
0x12bf   :  { %v1235_v59 = vpop.xlane.xlu1 %1234 }
0x12c0   :  { %v1239_v60 = vmul.f32 0.03125, %v1235_v59 }
0x12c1   :  { %v1238_v61 = vpop.xlane.xlu0 %1237 }
0x12c2   :  { %v1241_v0 = vsub.f32 %v1231_v55, %v1239_v60  ;;  %v1240_v1 = vmul.f32 0.03125, %v1238_v61 }
0x12c4   :  { %v1242_v19 = vsub.f32 %v1232_v57, %v1240_v1  ;;  %v1243_v3 = vmul.f32 %v1241_v0, %v1241_v0 }
0x12c6   :  { %v1245_v5 = vsel %vm134_vm10, %v1243_v3, 0.0  ;;  %v1244_v23 = vmul.f32 %v1242_v19, %v1242_v19 }
0x12c7   :  { %1246 = vadd.xlane.f32.xlu0 %v1245_v5 }
0x12c8   :  { %v1248_v22 = vsel %vm134_vm10, %v1244_v23, 0.0 }
0x12c9   :  { %1249 = vadd.xlane.f32.xlu1 %v1248_v22 }
0x1354   :  { %v1247_v7 = vpop.xlane.xlu0 %1246 }
0x1355   :  { %v1251_v8 = vmul.f32 0.03125, %v1247_v7 }
0x1356   :  { %v1250_v9 = vpop.xlane.xlu1 %1249 }
0x1357   :  { %v1253_v10 = vadd.f32 1e-05, %v1251_v8  ;;  %v1252_v11 = vmul.f32 0.03125, %v1250_v9 }
0x1359   :  { %2051 = vrsqrt.f32 %v1253_v10  ;;  %v1254_v12 = vadd.f32 1e-05, %v1252_v11 }
0x135b   :  { %2053 = vrsqrt.f32 %v1254_v12 }
0x1363   :  { %v2052_v13 = vpop.eup %2051 }
0x1364   :  { %v1257_v15 = vmul.f32 %v2052_v13, %v1241_v0  ;;  %v1999_v13 = vld [vmem:[#allocation2 + $0xc8] sm:$0xff]  }
0x1365   :  { %v2054_v16 = vpop.eup %2053 }
0x1366   :  { %v1264_v20 = vmul.f32 %v1725_v14, %v1257_v15  ;;  %v1258_v21 = vmul.f32 %v2054_v16, %v1242_v19 }
0x1368   :  { %v1265_v26 = vmul.f32 %v1725_v14, %v1258_v21  ;;  %v1271_v27 = vadd.f32 %v1726_v25, %v1264_v20  ;;  %v2000_v14 = vld [vmem:[#allocation2 + $0xd0] sm:$0xff]  }
0x136a   :  { %v1272_v28 = vadd.f32 %v1726_v25, %v1265_v26 }
0x136c   :  { %v1273_v29 = vpack.c.bf16 %v1272_v28, %v1271_v27 }
0x136e   :  { %1920 = vmatmul.mubr.msk.bf16.vlgmr.msra.gmra.mrb[28].mxu1 %vm134_vm10, %v1273_v29 }
0x136f   :  { %1939 = vmatprep.mubr.msk.bf16.mxu1 %vm2124_vm6, %v2123_v2  ;;  %1936 = vmatpush3.bf16.msra.mxu1 %v1999_v13 }
0x1370   :  { %1937 = vmatprep.subr.bf16.mxu1 %v2123_v2 }
0x1373   :  { %1938 = vmatpush3.bf16.msra.mxu1 %v2000_v14 }
0x1374   :  { %1943 = vmatprep.subr.bf16.mxu1 %v2123_v2 }
0x1441   :  { %v1332_v18 = vpop.f32.mrb[28].mxu1 }
0x1442   :  { %v1333_v34 = vadd.f32 %v1727_v33, %v1332_v18  ;;  %v1921_v35 = vpop.f32.mrb[29].mxu1 }
0x1443   :  { %v1335_v36 = vpop.f32.mrb[30].mxu1 }
0x1444   :  { %v1341_v37 = vmul.f32 0.044715, %v1333_v34  ;;  %v1336_v38 = vadd.f32 %v1727_v33, %v1335_v36  ;;  %v1922_v39 = vpop.f32.mrb[31].mxu1  ;;  %v1339_v52 = vmul.f32 0.5, %v1333_v34 }
0x1446   :  { %v1343_v40 = vmul.f32 %v1341_v37, %v1333_v34  ;;  %v1342_v41 = vmul.f32 0.044715, %v1336_v38  ;;  %v1340_v53 = vmul.f32 0.5, %v1336_v38 }
0x1448   :  { %v1345_v42 = vmul.f32 %v1343_v40, %v1333_v34  ;;  %v1344_v43 = vmul.f32 %v1342_v41, %v1336_v38 }
0x144a   :  { %v1347_v44 = vadd.f32 %v1345_v42, %v1333_v34  ;;  %v1346_v45 = vmul.f32 %v1344_v43, %v1336_v38  ;;  %v2001_v42 = vld [vmem:[#allocation2 + $0xd8] sm:$0xff]   ;;  %v2002_v43 = vld [vmem:[#allocation2 + $0xe0] sm:$0xff]  }
0x144c   :  { %v1349_v46 = vmul.f32 0.7978846, %v1347_v44  ;;  %v1348_v47 = vadd.f32 %v1346_v45, %v1336_v38  ;;  %v1739_v44 = vld [vmem:[%s2483_s4 + $0x12] ss:$0 sm:$0xff] }
0x144e   :  { %2055 = vtanh.f32 %v1349_v46  ;;  %v1350_v48 = vmul.f32 0.7978846, %v1348_v47 }
0x1450   :  { %2057 = vtanh.f32 %v1350_v48 }
0x1458   :  { %v2056_v49 = vpop.eup %2055 }
0x1459   :  { %v1353_v50 = vadd.f32 1.0, %v2056_v49 }
0x145a   :  { %v2058_v51 = vpop.eup %2057 }
0x145b   :  { %v1354_v62 = vadd.f32 1.0, %v2058_v51  ;;  %v1355_v54 = vmul.f32 %v1353_v50, %v1339_v52  ;;  %v1743_v52 = vld [vmem:[%s2483_s4 + $0x13] ss:$0 sm:$0xff] }
0x145d   :  { %v1356_v63 = vmul.f32 %v1354_v62, %v1340_v53 }
0x145f   :  { %v1357_v55 = vpack.c.bf16 %v1356_v63, %v1355_v54 }
0x1461   :  { %1932 = vmatmul.mubr.msk.bf16.vlgmr.msra.gmra.mrb[32].mxu0 %vm85_vm9, %v1357_v55 }
0x1534   :  { %v1432_v57 = vpop.f32.mrb[32].mxu0 }
0x1535   :  { %v1433_v58 = vadd.f32 %v1731_v56, %v1432_v57  ;;  %v1933_v59 = vpop.f32.mrb[33].mxu0  ;;  %v1633_v57 = vld [vmem:[%s2481_s2] sm:$0x3]  ;;  %s2131_s2 = smov [#allocation5]  }
0x1536   :  { %v1435_v60 = vpop.f32.mrb[34].mxu0 }
0x1537   :  { %v1436_v61 = vadd.f32 %v1731_v56, %v1435_v60  ;;  %v1934_v0 = vpop.f32.mrb[35].mxu0  ;;  %v1439_v1 = vadd.f32 %v1433_v58, %v1271_v27 }
0x1539   :  { %v1441_v19 = vsel %vm134_vm10, %v1439_v1, 0.0  ;;  %v1440_v3 = vadd.f32 %v1436_v61, %v1272_v28  ;;  %v1737_v28 = vld [vmem:[%s2483_s4 + $0x10] ss:$0 sm:$0xff]  ;;  %s1669_s4 = sshll.u32 %s2131_s2, 4  ;;  %s1670_s4 = int_to_ptr.vmem [resolvable:$true] %s1669_s4 }
0x153a   :  { %1442 = vadd.xlane.f32.xlu1 %v1441_v19  ;;  %s2093_s30 = scalar_lea.vmem %s1670_s4, 128  ;;  %p2098_p9 = scmp.lt.s32.totalorder %s1670_s4, %s1670_s4 }
0x153b   :  { %v1444_v5 = vsel %vm134_vm10, %v1440_v3, 0.0  ;;  %p2094_p8 = scmp.ne.s32.totalorder %s1670_s4, %s2093_s30  ;;  %p2099_p10 = scmp.lt.s32.totalorder %s2093_s30, %s2093_s30 }
0x153c   :  { %1445 = vadd.xlane.f32.xlu0 %v1444_v5 }
0x153d   :  { %p2100_p11 = por %p2099_p10, %p2098_p9 }
0x153f   :  { %p2101_p12 = pnand %p2100_p11, %p2094_p8 }
0x15c7   :  { %v1443_v23 = vpop.xlane.xlu1 %1442 }
0x15c8   :  { %v1447_v22 = vmul.f32 0.03125, %v1443_v23 }
0x15c9   :  { %v1446_v6 = vpop.xlane.xlu0 %1445 }
0x15ca   :  { %v1449_v24 = vsub.f32 %v1439_v1, %v1447_v22  ;;  %v1448_v7 = vmul.f32 0.03125, %v1446_v6 }
0x15cc   :  { %v1450_v8 = vsub.f32 %v1440_v3, %v1448_v7  ;;  %v1451_v9 = vmul.f32 %v1449_v24, %v1449_v24 }
0x15ce   :  { %v1453_v10 = vsel %vm134_vm10, %v1451_v9, 0.0  ;;  %v1452_v11 = vmul.f32 %v1450_v8, %v1450_v8 }
0x15cf   :  { %1454 = vadd.xlane.f32.xlu1 %v1453_v10 }
0x15d0   :  { %v1456_v12 = vsel %vm134_vm10, %v1452_v11, 0.0 }
0x15d1   :  { %1457 = vadd.xlane.f32.xlu0 %v1456_v12 }
0x165c   :  { %v1455_v15 = vpop.xlane.xlu1 %1454 }
0x165d   :  { %v1459_v16 = vmul.f32 0.03125, %v1455_v15 }
0x165e   :  { %v1458_v20 = vpop.xlane.xlu0 %1457 }
0x165f   :  { %v1461_v21 = vadd.f32 1e-05, %v1459_v16  ;;  %v1460_v25 = vmul.f32 0.03125, %v1458_v20 }
0x1661   :  { %2059 = vrsqrt.f32 %v1461_v21  ;;  %v1462_v26 = vadd.f32 1e-05, %v1460_v25 }
0x1663   :  { %2061 = vrsqrt.f32 %v1462_v26 }
0x166b   :  { %v2060_v27 = vpop.eup %2059 }
0x166c   :  { %v1465_v29 = vmul.f32 %v2060_v27, %v1449_v24 }
0x166d   :  { %v2062_v17 = vpop.eup %2061 }
0x166e   :  { %v1472_v31 = vmul.f32 %v1737_v28, %v1465_v29  ;;  %v1466_v32 = vmul.f32 %v2062_v17, %v1450_v8 }
0x1670   :  { %v1479_v33 = vadd.f32 %v1738_v30, %v1472_v31  ;;  %v1473_v18 = vmul.f32 %v1737_v28, %v1466_v32 }
0x1672   :  { %v1480_v34 = vadd.f32 %v1738_v30, %v1473_v18  ;;  %v1481_v35 = vpack.c.bf16 %v1479_v33, %v1479_v33 }
0x1674   :  { %v1482_v36 = vpack.c.bf16 %v1480_v34, %v1480_v34  ;;  %v1494_v38 = vunpack.c.l.b16 %v1481_v35 }
0x1676   :  { %v1495_v37 = vunpack.c.l.b16 %v1482_v36 }
0x1678   :  { %v1496_v39 = vrot.slane %v1495_v37, 7 }
0x167a   :  { %v1498_v40 = vsel %vm1497_vm12, %v1496_v39, %v1494_v38 }
0x167b   :  { %v1499_v41 = vpack.c.b16 %v1498_v40, %v1498_v40 }
0x167d   :  { %1940 = vmatmul.mubr.msk.bf16.vlgmr.msra.gmra.mrb[32].mxu1 %vm134_vm10, %v1499_v41 }
0x167e   :  { %1947 = vmatprep.mubr.msk.bf16.mxu1 %vm2124_vm6, %v2123_v2  ;;  %1944 = vmatpush3.bf16.msra.mxu1 %v2001_v42 }
0x167f   :  { %1945 = vmatprep.subr.bf16.mxu1 %v2123_v2 }
0x1682   :  { %1946 = vmatpush3.bf16.msra.mxu1 %v2002_v43 }
0x1750   :  { %v1549_v45 = vpop.f32.mrb[32].mxu1 }
0x1751   :  { %v1550_v46 = vadd.f32 %v1739_v44, %v1549_v45  ;;  %v1941_v47 = vpop.f32.mrb[33].mxu1 }
0x1752   :  { %v1552_v48 = vpop.f32.mrb[34].mxu1 }
0x1753   :  { %2063 = vtanh.f32 %v1550_v46  ;;  %v1942_v49 = vpop.f32.mrb[35].mxu1 }
0x175d   :  { %v2064_v50 = vpop.eup %2063 }
0x175e   :  { %v1556_v51 = vpack.c.bf16 %v2064_v50, %v2064_v50 }
0x1760   :  { %1948 = vmatmul.mubr.msk.bf16.vlgmr.msra.gmra.mrb[36].mxu1 %vm134_vm10, %v1556_v51 }
0x1833   :  { %v1615_v53 = vpop.f32.mrb[36].mxu1 }
0x1834   :  { %v1616_v62 = vadd.f32 %v1743_v52, %v1615_v53  ;;  %v1949_v54 = vpop.f32.mrb[37].mxu1 }
0x1835   :  { %v1618_v63 = vpop.f32.mrb[38].mxu1 }
0x1836   :  { %v1950_v55 = vpop.f32.mrb[39].mxu1  ;;  %v1622_v56 = vsel %vm1621_vm13, %v1616_v62, -inf }
0x1837   :  { %1623 = vmax.xlane.f32.xlu0 %v1622_v56 }
0x184d   :  { %1635 = vperm.xlu0 %1964, %v1633_v57  }
0x18c4   :  { %v1624_v58 = vpop.xlane.xlu0 %1623 }
0x18c5   :  { %v1625_v59 = vsub.f32 %v1616_v62, %v1624_v58 }
0x18c7   :  { %v1626_v60 = vmul.f32 1.442695, %v1625_v59 }
0x18c9   :  { %2065 = vpow2.f32 %v1626_v60 }
0x18cc   :  { %v1636_v19 = vpop.permute.xlu0 %1635 }
0x18cd   :  { %vm1637_vm14 = vcmp.eq.s32.totalorder %v2178_v4, %v1636_v19 }
0x18ce   :  { %v1747_v22 = vsel %vm1637_vm14, 1.0, %v2123_v2 }
0x18d3   :  { %v2066_v61 = vpop.eup %2065 }
0x18d4   :  { %v1628_v0 = vsel %vm1621_vm13, %v2066_v61, 0.0 }
0x18d5   :  { %1629 = vadd.xlane.f32.xlu1 %v1628_v0 }
0x1962   :  { %v1630_v1 = vpop.xlane.xlu1 %1629 }
0x1963   :  { %2067 = vlog2.f32 %v1630_v1 }
0x1964   :  { %2069 = vrcp.f32 %v1630_v1 }
0x196d   :  { %v2068_v3 = vpop.eup %2067 }
0x196e   :  { %v1641_v5 = vmul.f32 0.6931472, %v2068_v3  ;;  %v2070_v4 = vpop.eup %2069 }
0x196f   :  { %v1632_v2 = vmul.f32 %v2070_v4, %v2066_v61 }
0x1970   :  { %v1642_v23 = vsub.f32 %v1625_v59, %v1641_v5 }
0x1972   :  { %v1643_v6 = vmul.f32 %v1747_v22, %v1642_v23 }
0x1974   :  { %v1644_v24 = vsel %vm1621_vm13, %v1643_v6, 0.0 }
0x1975   :  { %1645 = vadd.xlane.f32.xlu1 %v1644_v24 }
0x1a02   :  { %v1646_v7 = vpop.xlane.xlu1 %1645 }
0x1a03   :  { %v1647_v8 = vsub.f32 0.0, %v1646_v7 }
0x1a05   :  { %v1649_v9 = vsel %vm1648_vm15, %v1647_v8, 0.0 }
0x1a06   :  { %v1650_v10 = vrot.slane %v1649_v9, 4 }
0x1a08   :  { %v1651_v11 = vadd.f32 %v1650_v10, %v1649_v9 }
0x1a0a   :  { %v1652_v12 = vrot.slane %v1651_v11, 2 }
0x1a0c   :  { %v1653_v13 = vadd.f32 %v1652_v12, %v1651_v11 }
0x1a0e   :  { %v1654_v14 = vrot.slane %v1653_v13, 1 }
0x1a10   :  { %v1655_v15 = vadd.f32 %v1654_v14, %v1653_v13 }
0x1a12   :  { %v1656_v16 = vmul.f32 0.5, %v1655_v15 }
0x1a14   :  { %v1658_v20 = vsel %vm1657_vm0, %v1632_v2, %v1656_v16 }
0x1a15   :  { %v1660_v21 = vsel %vm1659_vm1, %v1658_v20, 0.0 }
0x1a16   :  { %v1661_v25 = vsel %vm1648_vm15, %v1660_v21, 0.0 }
0x1a17   :  { %1662 = vst [vmem:[#allocation5] sm:$0xff] %v1661_v25 }
0x1a18   :  { %2104 = shalt.err (!%p2101_p12)
}
0x1a19   :  { %s2105_s3 = scalar_lea.hbm %s2484_s5, 128 }
0x1a1a   :  { %p2106_p13 = scmp.ne.s32.totalorder %s2484_s5, %s2105_s3  ;;  %p2109_p0 = scmp.lt.u32.totalorder %s2105_s3, %s2484_s5 }
0x1a1c   :  { %p2111_p1 = pnand %p2109_p0, %p2106_p13 }
0x1a1e   :  { %2114 = shalt.err (!%p2111_p1)
}
0x1a1f   :  { %1672 = dma.vmem_to_hbm [thread:$0]  %s1670_s4, 128, %s2484_s5, [#allocation4]  }
0x1a20   :  { %2117 = dma.done.wait [#allocation4], 128  }
0x1a21   :  { %2118 = vsyncadd [#allocation4], 4294967168 }
0x1a22   :  { %1676 = vsyncpa [#allocation3], 1 }
0x1a23   :  { %1677 = vsyncpa [#allocation4], 1 }

</bundles_post_ra>
